<compile_context>
chip_gen: v6e
topology: v6e:2x2x1
jax: 0.10.0
libtpu: 0.0.40
codegen_flags: <defaults>
</compile_context>

<pallas_src>
import numpy as np
import jax
import jax.numpy as jnp
from jax.experimental import pallas as pl
from jax.experimental.pallas import tpu as pltpu

EPS = 1e-5


# ---------------------------------------------------------------------------
# one-time, host-side parameter preparation (hoisted out of the forward jit)
# ---------------------------------------------------------------------------
def _block_toeplitz(w_oihw, w_img, lanes):
    """OIHW 3x3 conv weights -> (3*lanes, W*Cout) banded matrix.

    Row (ky*lanes + w_in*Cin + ci), column (w_out*Cout + c) holds
    w[c, ci, ky, w_in - w_out + 1] when |w_in - w_out| <= 1, else 0; rows with
    lane index >= W*Cin are zero (lane padding to `lanes`).  Multiplying the
    three vertically shifted windows of the zero-row-padded activation buffer
    (concatenated along lanes) by this matrix performs the 3x3 'same' conv
    with a lane-dense (channel-minor) output.
    """
    cout, cin = w_oihw.shape[0], w_oihw.shape[1]
    wt = np.transpose(np.asarray(w_oihw, np.float32), (2, 3, 1, 0))  # (3,3,Ci,Co)
    bands = []
    for ky in range(3):
        blk = np.zeros((w_img * cin, w_img * cout), np.float32)
        for kx in range(3):
            sel = np.eye(w_img, w_img, k=1 - kx, dtype=np.float32)   # w_in == w+kx-1
            blk += np.kron(sel, wt[ky, kx])
        band = np.zeros((lanes, w_img * cout), np.float32)
        band[:w_img * cin] = blk
        bands.append(band)
    return np.concatenate(bands, axis=0)


def prepare_params(params, H, W):
    """Pack parameters once (numpy, outside the jit path)."""
    w1 = np.asarray(params["w1"], np.float32)     # (C1, Cin, 3, 3)
    w2 = np.asarray(params["w2"], np.float32)     # (C2, C1, 3, 3)
    c1, cin = w1.shape[0], w1.shape[1]
    c2 = w2.shape[0]
    lanes = W * c1                                # shared lane width (128 here)
    assert W * cin <= lanes and W * c2 == lanes, "unsupported channel config"
    assert lanes % 128 == 0, "lane width must be a multiple of 128"

    def tile_lane(v):                             # per-channel -> (1, W*Cout)
        return jnp.asarray(np.tile(np.asarray(v, np.float32), W)[None, :])

    return {
        "wb1": jnp.asarray(_block_toeplitz(w1, W, lanes)),   # (3*lanes, lanes)
        "wb2": jnp.asarray(_block_toeplitz(w2, W, lanes)),   # (3*lanes, lanes)
        # Conv biases intentionally not packed: they cancel exactly under
        # batch-statistics (train-mode) BatchNorm.
        "g1": tile_lane(params["gamma1"]), "b1": tile_lane(params["beta1"]),
        "g2": tile_lane(params["gamma2"]), "b2": tile_lane(params["beta2"]),
    }


# ---------------------------------------------------------------------------
# the single fused kernel
# ---------------------------------------------------------------------------
def _make_kernel(n, h, w_img, cout, lanes):
    hp = h + 2                   # rows per image incl. one zero row above/below
    mpad = n * hp                # rows of the padded activation buffer
    mout = mpad - 2              # rows produced by the shifted-band matmul
    inv_count = 1.0 / float(n * h * w_img)    # BN reduces over N*H*W

    def kernel(xp_ref, wb1_ref, wb2_ref, g1_ref, bt1_ref, g2_ref, bt2_ref,
               out_ref, apad_ref):
        # Valid-row mask: band-matmul output row i is a real image row iff
        # (i mod (H+2)) < H; the two rows between images are boundary junk
        # (finite values, just excluded from stats and zeroed).
        row = jax.lax.broadcasted_iota(jnp.int32, (mout, lanes), 0)
        valid = ((row % hp) < h).astype(jnp.float32)

        # Channel-pooling matrix (built once, reused by both layers):
        # pool[i, j] = 1/(N*H*W) if lanes i and j hold the same channel, so
        # column_sums @ pool == per-channel mean already broadcast over W
        # (stays lane-dense, no (.., Cout) lane-sparse intermediates).
        ri = jax.lax.broadcasted_iota(jnp.int32, (lanes, lanes), 0)
        ci = jax.lax.broadcasted_iota(jnp.int32, (lanes, lanes), 1)
        pool = ((ri % cout) == (ci % cout)).astype(jnp.float32) * inv_count

        def conv_bn_relu(src_ref, wb_ref, g_ref, b_ref):
            # 3x3 'same' conv of the WHOLE batch as ONE MXU matmul:
            # three vertically shifted windows of the padded buffer, lane-
            # aligned concat (offsets 0 / lanes / 2*lanes), times the banded
            # block-Toeplitz weights.  M = mout, K = 3*lanes, N = W*Cout.
            patch = jnp.concatenate(
                [src_ref[pl.ds(0, mout), :],
                 src_ref[pl.ds(1, mout), :],
                 src_ref[pl.ds(2, mout), :]], axis=1)
            acc = jnp.dot(patch, wb_ref[...],
                          preferred_element_type=jnp.float32)    # (mout, lanes)

            # Train-mode BatchNorm statistics over the valid rows (two-pass,
            # biased variance), pooled per channel with the pool matmul.
            mean = jnp.dot(jnp.sum(acc * valid, axis=0, keepdims=True), pool,
                           preferred_element_type=jnp.float32)   # (1, lanes)
            cen = (acc - mean) * valid
            var = jnp.dot(jnp.sum(cen * cen, axis=0, keepdims=True), pool,
                          preferred_element_type=jnp.float32)    # (1, lanes)
            scale = g_ref[...] * jax.lax.rsqrt(var + EPS)
            shift = b_ref[...] - mean * scale
            return jnp.maximum(acc * scale + shift, 0.0) * valid

        a1 = conv_bn_relu(xp_ref, wb1_ref, g1_ref, bt1_ref)

        # Re-pad for layer 2 entirely in VMEM (no HBM round trip): the junk
        # rows of a1 are already zero (masked), so they become the inter-image
        # zero rows; only the outermost two rows need explicit zeros.
        zrow = jnp.zeros((1, lanes), jnp.float32)
        apad_ref[...] = jnp.concatenate([zrow, a1, zrow], axis=0)

        a2 = conv_bn_relu(apad_ref, wb2_ref, g2_ref, bt2_ref)

        # Copy the H valid rows of each image into the dense output
        # (static unroll; n is tiny).
        for i in range(n):
            out_ref[pl.ds(i * h, h), :] = a2[i * hp:i * hp + h, :]

    return kernel


# ---------------------------------------------------------------------------
# forward wrapper
# ---------------------------------------------------------------------------
@jax.jit
def double_conv_cob(x_nchw, prep):
    """DoubleConvCOB forward. x_nchw: (N, in_ch, H, W) f32 -> (N, out_ch, H, W)."""
    n, cin, h, w_img = x_nchw.shape
    lanes = prep["wb1"].shape[0] // 3          # = W * out_ch
    cout = prep["wb2"].shape[1] // w_img
    hp = h + 2

    # NCHW -> channel-minor rows, one zero row above/below each image,
    # lane-padded to `lanes` (tiny ops fused into the same executable).
    x_rows = jnp.transpose(x_nchw, (0, 2, 3, 1)).reshape(n, h, w_img * cin)
    xp = jnp.zeros((n, hp, lanes), jnp.float32)
    xp = xp.at[:, 1:h + 1, :w_img * cin].set(x_rows)
    xp = xp.reshape(n * hp, lanes)

    out_rows = pl.pallas_call(
        _make_kernel(n, h, w_img, cout, lanes),
        grid=(1,),
        in_specs=[pl.BlockSpec((n * hp, lanes), lambda i: (0, 0)),
                  pl.BlockSpec((3 * lanes, lanes), lambda i: (0, 0)),
                  pl.BlockSpec((3 * lanes, lanes), lambda i: (0, 0)),
                  pl.BlockSpec((1, lanes), lambda i: (0, 0)),
                  pl.BlockSpec((1, lanes), lambda i: (0, 0)),
                  pl.BlockSpec((1, lanes), lambda i: (0, 0)),
                  pl.BlockSpec((1, lanes), lambda i: (0, 0))],
        out_specs=pl.BlockSpec((n * h, lanes), lambda i: (0, 0)),
        out_shape=jax.ShapeDtypeStruct((n * h, lanes), jnp.float32),
        scratch_shapes=[pltpu.VMEM((n * hp, lanes), jnp.float32)],
        compiler_params=pltpu.CompilerParams(
            dimension_semantics=("arbitrary",)),
    )(xp, prep["wb1"], prep["wb2"],
      prep["g1"], prep["b1"], prep["g2"], prep["b2"])

    # lane-dense rows -> NCHW
    return jnp.transpose(out_rows.reshape(n, h, w_img, cout), (0, 3, 1, 2))


# ---------------------------------------------------------------------------
# pure-JAX reference (NCHW, includes the conv bias that BN cancels)
# ---------------------------------------------------------------------------
def reference_forward(x_nchw, params):
    def block(x, w, b, gamma, beta):
        y = jax.lax.conv_general_dilated(
            x, w, window_strides=(1, 1), padding=((1, 1), (1, 1)),
            dimension_numbers=("NCHW", "OIHW", "NCHW"))
        y = y + b[None, :, None, None]
        mean = jnp.mean(y, axis=(0, 2, 3), keepdims=True)
        var = jnp.mean((y - mean) ** 2, axis=(0, 2, 3), keepdims=True)
        y = (y - mean) * jax.lax.rsqrt(var + EPS)
        y = y * gamma[None, :, None, None] + beta[None, :, None, None]
        return jnp.maximum(y, 0.0)

    x = block(x_nchw, params["w1"], params["b1"],
              params["gamma1"], params["beta1"])
    x = block(x, params["w2"], params["b2"],
              params["gamma2"], params["beta2"])
    return x


def init_params(key, in_ch, out_ch):
    k1, k2, k3, k4 = jax.random.split(key, 4)
    return {
        # conv weights in PyTorch OIHW layout
        "w1": 0.1 * jax.random.normal(k1, (out_ch, in_ch, 3, 3), jnp.float32),
        "b1": 0.05 * jax.random.normal(k2, (out_ch,), jnp.float32),
        "gamma1": jnp.ones((out_ch,), jnp.float32),
        "beta1": jnp.zeros((out_ch,), jnp.float32),
        "w2": 0.1 * jax.random.normal(k3, (out_ch, out_ch, 3, 3), jnp.float32),
        "b2": 0.05 * jax.random.normal(k4, (out_ch,), jnp.float32),
        "gamma2": jnp.ones((out_ch,), jnp.float32),
        "beta2": jnp.zeros((out_ch,), jnp.float32),
    }


if __name__ == "__main__":
    key = jax.random.PRNGKey(0)
    kx, kp = jax.random.split(key)

    N, in_ch, out_ch, H, W = 2, 4, 8, 16, 16
    x = jax.random.normal(kx, (N, in_ch, H, W), jnp.float32)
    params = init_params(kp, in_ch, out_ch)

    prep = prepare_params(params, H, W)        # hoisted: built exactly once

    out = jax.block_until_ready(double_conv_cob(x, prep))
    ref = jax.block_until_ready(reference_forward(x, params))

    assert out.shape == (N, out_ch, H, W), out.shape
    np.testing.assert_allclose(np.asarray(out), np.asarray(ref),
                               rtol=1e-4, atol=1e-4)

    print("KERNEL_OK")
</pallas_src>

<mosaic_0001>
module attributes {stable_mosaic.version = 11 : i64} {
  func.func @kernel(%arg0: i32, %arg1: memref<36x128xf32, #tpu.memory_space<vmem>>, %arg2: memref<384x128xf32, #tpu.memory_space<vmem>>, %arg3: memref<384x128xf32, #tpu.memory_space<vmem>>, %arg4: memref<1x128xf32, #tpu.memory_space<vmem>>, %arg5: memref<1x128xf32, #tpu.memory_space<vmem>>, %arg6: memref<1x128xf32, #tpu.memory_space<vmem>>, %arg7: memref<1x128xf32, #tpu.memory_space<vmem>>, %arg8: memref<32x128xf32, #tpu.memory_space<vmem>>, %arg9: memref<36x128xf32, #tpu.memory_space<vmem>>) attributes {dimension_semantics = [#tpu.dimension_semantics<arbitrary>], iteration_bounds = array<i64: 1>, scalar_prefetch = 0 : i64, scratch_operands = 1 : i64, tpu.core_type = #tpu.core_type<tc>, window_params = [{pipeline_mode = #tpu.pipeline_mode<synchronous>, transform_indices = @transform_0, window_bounds = array<i64: 36, 128>}, {pipeline_mode = #tpu.pipeline_mode<synchronous>, transform_indices = @transform_1, window_bounds = array<i64: 384, 128>}, {pipeline_mode = #tpu.pipeline_mode<synchronous>, transform_indices = @transform_2, window_bounds = array<i64: 384, 128>}, {pipeline_mode = #tpu.pipeline_mode<synchronous>, transform_indices = @transform_3, window_bounds = array<i64: 1, 128>}, {pipeline_mode = #tpu.pipeline_mode<synchronous>, transform_indices = @transform_4, window_bounds = array<i64: 1, 128>}, {pipeline_mode = #tpu.pipeline_mode<synchronous>, transform_indices = @transform_5, window_bounds = array<i64: 1, 128>}, {pipeline_mode = #tpu.pipeline_mode<synchronous>, transform_indices = @transform_6, window_bounds = array<i64: 1, 128>}, {pipeline_mode = #tpu.pipeline_mode<synchronous>, transform_indices = @transform_7, window_bounds = array<i64: 32, 128>}]} {
    %0 = tpu.iota {dimensions = array<i32: 0>} : vector<34x128xi32>
    %c18_i32 = arith.constant 18 : i32
    %c0_i32 = arith.constant 0 : i32
    %1 = arith.cmpi eq, %c18_i32, %c0_i32 : i32
    %c1_i32 = arith.constant 1 : i32
    %2 = arith.select %1, %c1_i32, %c18_i32 : i32
    %3 = vector.broadcast %2 : i32 to vector<34x128xi32>
    %4 = arith.remsi %0, %3 : vector<34x128xi32>
    %c0_i32_0 = arith.constant 0 : i32
    %5 = vector.broadcast %c0_i32_0 : i32 to vector<34x128xi32>
    %6 = arith.cmpi ne, %4, %5 : vector<34x128xi32>
    %c0_i32_1 = arith.constant 0 : i32
    %7 = vector.broadcast %c0_i32_1 : i32 to vector<34x128xi32>
    %8 = arith.cmpi slt, %4, %7 : vector<34x128xi32>
    %c0_i32_2 = arith.constant 0 : i32
    %9 = arith.cmpi slt, %2, %c0_i32_2 : i32
    %10 = vector.broadcast %9 : i1 to vector<34x128xi1>
    %11 = vector.broadcast %10 : vector<34x128xi1> to vector<34x128xi1>
    %12 = arith.xori %8, %11 : vector<34x128xi1>
    %13 = arith.andi %12, %6 : vector<34x128xi1>
    %14 = vector.broadcast %2 : i32 to vector<34x128xi32>
    %15 = arith.addi %4, %14 : vector<34x128xi32>
    %16 = arith.select %13, %15, %4 : vector<34x128xi1>, vector<34x128xi32>
    %c16_i32 = arith.constant 16 : i32
    %17 = vector.broadcast %c16_i32 : i32 to vector<34x128xi32>
    %18 = arith.cmpi slt, %16, %17 : vector<34x128xi32>
    %19 = arith.extui %18 : vector<34x128xi1> to vector<34x128xi32>
    %20 = arith.sitofp %19 : vector<34x128xi32> to vector<34x128xf32>
    %21 = tpu.iota {dimensions = array<i32: 0>} : vector<128x128xi32>
    %22 = tpu.iota {dimensions = array<i32: 1>} : vector<128x128xi32>
    %c8_i32 = arith.constant 8 : i32
    %c0_i32_3 = arith.constant 0 : i32
    %23 = arith.cmpi eq, %c8_i32, %c0_i32_3 : i32
    %c1_i32_4 = arith.constant 1 : i32
    %24 = arith.select %23, %c1_i32_4, %c8_i32 : i32
    %25 = vector.broadcast %24 : i32 to vector<128x128xi32>
    %26 = arith.remsi %21, %25 : vector<128x128xi32>
    %c0_i32_5 = arith.constant 0 : i32
    %27 = vector.broadcast %c0_i32_5 : i32 to vector<128x128xi32>
    %28 = arith.cmpi ne, %26, %27 : vector<128x128xi32>
    %c0_i32_6 = arith.constant 0 : i32
    %29 = vector.broadcast %c0_i32_6 : i32 to vector<128x128xi32>
    %30 = arith.cmpi slt, %26, %29 : vector<128x128xi32>
    %c0_i32_7 = arith.constant 0 : i32
    %31 = arith.cmpi slt, %24, %c0_i32_7 : i32
    %32 = vector.broadcast %31 : i1 to vector<128x128xi1>
    %33 = vector.broadcast %32 : vector<128x128xi1> to vector<128x128xi1>
    %34 = arith.xori %30, %33 : vector<128x128xi1>
    %35 = arith.andi %34, %28 : vector<128x128xi1>
    %36 = vector.broadcast %24 : i32 to vector<128x128xi32>
    %37 = arith.addi %26, %36 : vector<128x128xi32>
    %38 = arith.select %35, %37, %26 : vector<128x128xi1>, vector<128x128xi32>
    %c8_i32_8 = arith.constant 8 : i32
    %c0_i32_9 = arith.constant 0 : i32
    %39 = arith.cmpi eq, %c8_i32_8, %c0_i32_9 : i32
    %c1_i32_10 = arith.constant 1 : i32
    %40 = arith.select %39, %c1_i32_10, %c8_i32_8 : i32
    %41 = vector.broadcast %40 : i32 to vector<128x128xi32>
    %42 = arith.remsi %22, %41 : vector<128x128xi32>
    %c0_i32_11 = arith.constant 0 : i32
    %43 = vector.broadcast %c0_i32_11 : i32 to vector<128x128xi32>
    %44 = arith.cmpi ne, %42, %43 : vector<128x128xi32>
    %c0_i32_12 = arith.constant 0 : i32
    %45 = vector.broadcast %c0_i32_12 : i32 to vector<128x128xi32>
    %46 = arith.cmpi slt, %42, %45 : vector<128x128xi32>
    %c0_i32_13 = arith.constant 0 : i32
    %47 = arith.cmpi slt, %40, %c0_i32_13 : i32
    %48 = vector.broadcast %47 : i1 to vector<128x128xi1>
    %49 = vector.broadcast %48 : vector<128x128xi1> to vector<128x128xi1>
    %50 = arith.xori %46, %49 : vector<128x128xi1>
    %51 = arith.andi %50, %44 : vector<128x128xi1>
    %52 = vector.broadcast %40 : i32 to vector<128x128xi32>
    %53 = arith.addi %42, %52 : vector<128x128xi32>
    %54 = arith.select %51, %53, %42 : vector<128x128xi1>, vector<128x128xi32>
    %55 = arith.cmpi eq, %38, %54 : vector<128x128xi32>
    %56 = arith.extui %55 : vector<128x128xi1> to vector<128x128xi32>
    %57 = arith.sitofp %56 : vector<128x128xi32> to vector<128x128xf32>
    %cst = arith.constant 0.001953125 : f32
    %58 = vector.broadcast %cst : f32 to vector<128x128xf32>
    %59 = arith.mulf %57, %58 : vector<128x128xf32>
    %c0 = arith.constant 0 : index
    %c0_14 = arith.constant 0 : index
    %60 = vector.load %arg1[%c0, %c0_14] : memref<36x128xf32, #tpu.memory_space<vmem>>, vector<34x128xf32>
    %c1 = arith.constant 1 : index
    %c0_15 = arith.constant 0 : index
    %61 = vector.load %arg1[%c1, %c0_15] : memref<36x128xf32, #tpu.memory_space<vmem>>, vector<34x128xf32>
    %c2 = arith.constant 2 : index
    %c0_16 = arith.constant 0 : index
    %62 = vector.load %arg1[%c2, %c0_16] : memref<36x128xf32, #tpu.memory_space<vmem>>, vector<34x128xf32>
    %63 = tpu.concatenate %60, %61, %62 in 1 : vector<34x128xf32>, vector<34x128xf32>, vector<34x128xf32> -> vector<34x384xf32>
    %c0_17 = arith.constant 0 : index
    %c0_18 = arith.constant 0 : index
    %64 = vector.load %arg2[%c0_17, %c0_18] : memref<384x128xf32, #tpu.memory_space<vmem>>, vector<384x128xf32>
    %cst_19 = arith.constant dense<0.000000e+00> : vector<34x128xf32>
    %65 = tpu.matmul %63, %64, %cst_19 {dimension_numbers = #tpu.dot_dimension_numbers<[1], [0], [0], [1], [0, 0, 1, 1], [], []>} : vector<34x384xf32>, vector<384x128xf32>, vector<34x128xf32> -> vector<34x128xf32>
    %66 = arith.mulf %65, %20 : vector<34x128xf32>
    %cst_20 = arith.constant dense<0.000000e+00> : vector<128xf32>
    %67 = vector.multi_reduction <add>, %66, %cst_20 [0] : vector<34x128xf32> to vector<128xf32>
    %68 = vector.shape_cast %67 : vector<128xf32> to vector<1x128xf32>
    %cst_21 = arith.constant dense<0.000000e+00> : vector<1x128xf32>
    %69 = tpu.matmul %68, %59, %cst_21 {dimension_numbers = #tpu.dot_dimension_numbers<[1], [0], [0], [1], [0, 0, 1, 1], [], []>} : vector<1x128xf32>, vector<128x128xf32>, vector<1x128xf32> -> vector<1x128xf32>
    %70 = vector.broadcast %69 : vector<1x128xf32> to vector<34x128xf32>
    %71 = arith.subf %65, %70 : vector<34x128xf32>
    %72 = arith.mulf %71, %20 : vector<34x128xf32>
    %73 = arith.mulf %72, %72 : vector<34x128xf32>
    %cst_22 = arith.constant dense<0.000000e+00> : vector<128xf32>
    %74 = vector.multi_reduction <add>, %73, %cst_22 [0] : vector<34x128xf32> to vector<128xf32>
    %75 = vector.shape_cast %74 : vector<128xf32> to vector<1x128xf32>
    %cst_23 = arith.constant dense<0.000000e+00> : vector<1x128xf32>
    %76 = tpu.matmul %75, %59, %cst_23 {dimension_numbers = #tpu.dot_dimension_numbers<[1], [0], [0], [1], [0, 0, 1, 1], [], []>} : vector<1x128xf32>, vector<128x128xf32>, vector<1x128xf32> -> vector<1x128xf32>
    %c0_24 = arith.constant 0 : index
    %c0_25 = arith.constant 0 : index
    %77 = vector.load %arg4[%c0_24, %c0_25] : memref<1x128xf32, #tpu.memory_space<vmem>>, vector<1x128xf32>
    %cst_26 = arith.constant 9.99999974E-6 : f32
    %78 = vector.broadcast %cst_26 : f32 to vector<1x128xf32>
    %79 = arith.addf %76, %78 : vector<1x128xf32>
    %80 = math.rsqrt %79 : vector<1x128xf32>
    %81 = arith.mulf %77, %80 : vector<1x128xf32>
    %c0_27 = arith.constant 0 : index
    %c0_28 = arith.constant 0 : index
    %82 = vector.load %arg5[%c0_27, %c0_28] : memref<1x128xf32, #tpu.memory_space<vmem>>, vector<1x128xf32>
    %83 = arith.mulf %69, %81 : vector<1x128xf32>
    %84 = arith.subf %82, %83 : vector<1x128xf32>
    %85 = vector.broadcast %81 : vector<1x128xf32> to vector<34x128xf32>
    %86 = arith.mulf %65, %85 : vector<34x128xf32>
    %87 = vector.broadcast %84 : vector<1x128xf32> to vector<34x128xf32>
    %88 = arith.addf %86, %87 : vector<34x128xf32>
    %cst_29 = arith.constant 0.000000e+00 : f32
    %89 = vector.broadcast %cst_29 : f32 to vector<34x128xf32>
    %90 = arith.maximumf %88, %89 : vector<34x128xf32>
    %91 = arith.mulf %90, %20 : vector<34x128xf32>
    %cst_30 = arith.constant 0.000000e+00 : f32
    %92 = vector.broadcast %cst_30 : f32 to vector<1x128xf32>
    %93 = tpu.concatenate %92, %91, %92 in 0 : vector<1x128xf32>, vector<34x128xf32>, vector<1x128xf32> -> vector<36x128xf32>
    %c0_31 = arith.constant 0 : index
    %c0_32 = arith.constant 0 : index
    %94 = vector.load %arg9[%c0_31, %c0_32] : memref<36x128xf32, #tpu.memory_space<vmem>>, vector<36x128xf32>
    tpu.vector_store %arg9[%c0_31, %c0_32], %93 {strides = array<i32>} : memref<36x128xf32, #tpu.memory_space<vmem>>, vector<36x128xf32>,
    %c0_33 = arith.constant 0 : index
    %c0_34 = arith.constant 0 : index
    %95 = vector.load %arg9[%c0_33, %c0_34] : memref<36x128xf32, #tpu.memory_space<vmem>>, vector<34x128xf32>
    %c1_35 = arith.constant 1 : index
    %c0_36 = arith.constant 0 : index
    %96 = vector.load %arg9[%c1_35, %c0_36] : memref<36x128xf32, #tpu.memory_space<vmem>>, vector<34x128xf32>
    %c2_37 = arith.constant 2 : index
    %c0_38 = arith.constant 0 : index
    %97 = vector.load %arg9[%c2_37, %c0_38] : memref<36x128xf32, #tpu.memory_space<vmem>>, vector<34x128xf32>
    %98 = tpu.concatenate %95, %96, %97 in 1 : vector<34x128xf32>, vector<34x128xf32>, vector<34x128xf32> -> vector<34x384xf32>
    %c0_39 = arith.constant 0 : index
    %c0_40 = arith.constant 0 : index
    %99 = vector.load %arg3[%c0_39, %c0_40] : memref<384x128xf32, #tpu.memory_space<vmem>>, vector<384x128xf32>
    %cst_41 = arith.constant dense<0.000000e+00> : vector<34x128xf32>
    %100 = tpu.matmul %98, %99, %cst_41 {dimension_numbers = #tpu.dot_dimension_numbers<[1], [0], [0], [1], [0, 0, 1, 1], [], []>} : vector<34x384xf32>, vector<384x128xf32>, vector<34x128xf32> -> vector<34x128xf32>
    %101 = arith.mulf %100, %20 : vector<34x128xf32>
    %cst_42 = arith.constant dense<0.000000e+00> : vector<128xf32>
    %102 = vector.multi_reduction <add>, %101, %cst_42 [0] : vector<34x128xf32> to vector<128xf32>
    %103 = vector.shape_cast %102 : vector<128xf32> to vector<1x128xf32>
    %cst_43 = arith.constant dense<0.000000e+00> : vector<1x128xf32>
    %104 = tpu.matmul %103, %59, %cst_43 {dimension_numbers = #tpu.dot_dimension_numbers<[1], [0], [0], [1], [0, 0, 1, 1], [], []>} : vector<1x128xf32>, vector<128x128xf32>, vector<1x128xf32> -> vector<1x128xf32>
    %105 = vector.broadcast %104 : vector<1x128xf32> to vector<34x128xf32>
    %106 = arith.subf %100, %105 : vector<34x128xf32>
    %107 = arith.mulf %106, %20 : vector<34x128xf32>
    %108 = arith.mulf %107, %107 : vector<34x128xf32>
    %cst_44 = arith.constant dense<0.000000e+00> : vector<128xf32>
    %109 = vector.multi_reduction <add>, %108, %cst_44 [0] : vector<34x128xf32> to vector<128xf32>
    %110 = vector.shape_cast %109 : vector<128xf32> to vector<1x128xf32>
    %cst_45 = arith.constant dense<0.000000e+00> : vector<1x128xf32>
    %111 = tpu.matmul %110, %59, %cst_45 {dimension_numbers = #tpu.dot_dimension_numbers<[1], [0], [0], [1], [0, 0, 1, 1], [], []>} : vector<1x128xf32>, vector<128x128xf32>, vector<1x128xf32> -> vector<1x128xf32>
    %c0_46 = arith.constant 0 : index
    %c0_47 = arith.constant 0 : index
    %112 = vector.load %arg6[%c0_46, %c0_47] : memref<1x128xf32, #tpu.memory_space<vmem>>, vector<1x128xf32>
    %cst_48 = arith.constant 9.99999974E-6 : f32
    %113 = vector.broadcast %cst_48 : f32 to vector<1x128xf32>
    %114 = arith.addf %111, %113 : vector<1x128xf32>
    %115 = math.rsqrt %114 : vector<1x128xf32>
    %116 = arith.mulf %112, %115 : vector<1x128xf32>
    %c0_49 = arith.constant 0 : index
    %c0_50 = arith.constant 0 : index
    %117 = vector.load %arg7[%c0_49, %c0_50] : memref<1x128xf32, #tpu.memory_space<vmem>>, vector<1x128xf32>
    %118 = arith.mulf %104, %116 : vector<1x128xf32>
    %119 = arith.subf %117, %118 : vector<1x128xf32>
    %120 = vector.broadcast %116 : vector<1x128xf32> to vector<34x128xf32>
    %121 = arith.mulf %100, %120 : vector<34x128xf32>
    %122 = vector.broadcast %119 : vector<1x128xf32> to vector<34x128xf32>
    %123 = arith.addf %121, %122 : vector<34x128xf32>
    %cst_51 = arith.constant 0.000000e+00 : f32
    %124 = vector.broadcast %cst_51 : f32 to vector<34x128xf32>
    %125 = arith.maximumf %123, %124 : vector<34x128xf32>
    %126 = arith.mulf %125, %20 : vector<34x128xf32>
    %127 = vector.extract_strided_slice %126 {offsets = [0, 0], sizes = [16, 128], strides = [1, 1]} : vector<34x128xf32> to vector<16x128xf32>
    %c0_52 = arith.constant 0 : index
    %c0_53 = arith.constant 0 : index
    %128 = vector.load %arg8[%c0_52, %c0_53] : memref<32x128xf32, #tpu.memory_space<vmem>>, vector<16x128xf32>
    tpu.vector_store %arg8[%c0_52, %c0_53], %127 {strides = array<i32>} : memref<32x128xf32, #tpu.memory_space<vmem>>, vector<16x128xf32>,
    %129 = vector.extract_strided_slice %126 {offsets = [18, 0], sizes = [16, 128], strides = [1, 1]} : vector<34x128xf32> to vector<16x128xf32>
    %c16 = arith.constant 16 : index
    %c0_54 = arith.constant 0 : index
    %130 = vector.load %arg8[%c16, %c0_54] : memref<32x128xf32, #tpu.memory_space<vmem>>, vector<16x128xf32>
    tpu.vector_store %arg8[%c16, %c0_54], %129 {strides = array<i32>} : memref<32x128xf32, #tpu.memory_space<vmem>>, vector<16x128xf32>,
    return
  }
  func.func @transform_0(%arg0: i32) -> (i32, i32) {
    %c0_i32 = arith.constant 0 : i32
    %c0_i32_0 = arith.constant 0 : i32
    %c0_i32_1 = arith.constant 0 : i32
    return %c0_i32, %c0_i32_0 : i32, i32
  }
  func.func @transform_1(%arg0: i32) -> (i32, i32) {
    %c0_i32 = arith.constant 0 : i32
    %c0_i32_0 = arith.constant 0 : i32
    %c0_i32_1 = arith.constant 0 : i32
    return %c0_i32, %c0_i32_0 : i32, i32
  }
  func.func @transform_2(%arg0: i32) -> (i32, i32) {
    %c0_i32 = arith.constant 0 : i32
    %c0_i32_0 = arith.constant 0 : i32
    %c0_i32_1 = arith.constant 0 : i32
    return %c0_i32, %c0_i32_0 : i32, i32
  }
  func.func @transform_3(%arg0: i32) -> (i32, i32) {
    %c0_i32 = arith.constant 0 : i32
    %c0_i32_0 = arith.constant 0 : i32
    %c0_i32_1 = arith.constant 0 : i32
    return %c0_i32, %c0_i32_0 : i32, i32
  }
  func.func @transform_4(%arg0: i32) -> (i32, i32) {
    %c0_i32 = arith.constant 0 : i32
    %c0_i32_0 = arith.constant 0 : i32
    %c0_i32_1 = arith.constant 0 : i32
    return %c0_i32, %c0_i32_0 : i32, i32
  }
  func.func @transform_5(%arg0: i32) -> (i32, i32) {
    %c0_i32 = arith.constant 0 : i32
    %c0_i32_0 = arith.constant 0 : i32
    %c0_i32_1 = arith.constant 0 : i32
    return %c0_i32, %c0_i32_0 : i32, i32
  }
  func.func @transform_6(%arg0: i32) -> (i32, i32) {
    %c0_i32 = arith.constant 0 : i32
    %c0_i32_0 = arith.constant 0 : i32
    %c0_i32_1 = arith.constant 0 : i32
    return %c0_i32, %c0_i32_0 : i32, i32
  }
  func.func @transform_7(%arg0: i32) -> (i32, i32) {
    %c0_i32 = arith.constant 0 : i32
    %c0_i32_0 = arith.constant 0 : i32
    %c0_i32_1 = arith.constant 0 : i32
    return %c0_i32, %c0_i32_0 : i32, i32
  }
}

</mosaic_0001>

<bundles_post_ra>
// kernel: double_conv_cob.1
= control target key start
LH: loop header
LB: loop body
LE: loop exit
PB: predicated region body
PF: predicated region fallthrough
CT: control target
= control target key end

     0   :  { %12 = vsyncpa [#allocation4], 0  ;;  %s1897_s24 = smov [#allocation3]   ;;  %s2618_s0 = inlined_call_operand.vmem [shape: f32[36,128], index: 0, kind: input, shape index: {}]   ;;  %s2619_s1 = inlined_call_operand.vmem [shape: f32[384,128], index: 1, kind: input, shape index: {}]   ;;  %s2620_s2 = inlined_call_operand.hbm [shape: f32[384,128], index: 2, kind: input, shape index: {}]   ;;  %s2621_s3 = inlined_call_operand.vmem [shape: f32[1,128], index: 3, kind: input, shape index: {}]   ;;  %s2622_s4 = inlined_call_operand.vmem [shape: f32[1,128], index: 4, kind: input, shape index: {}]   ;;  %s2623_s5 = inlined_call_operand.vmem [shape: f32[1,128], index: 5, kind: input, shape index: {}]   ;;  %s2624_s6 = inlined_call_operand.vmem [shape: f32[1,128], index: 6, kind: input, shape index: {}]   ;;  %s2625_s7 = inlined_call_operand.vmem [shape: f32[32,128], index: 7, kind: output, shape index: {}]  }
   0x1   :  { %s22_s25 = sshll.u32 %s1897_s24, 4  ;;  %s23_s25 = int_to_ptr.vmem [resolvable:$true] %s22_s25 }
   0x2   :  { %s1883_s26 = scalar_lea.vmem %s23_s25, 6144  ;;  %p1888_p1 = scmp.lt.s32.totalorder %s23_s25, %s23_s25 }
   0x3   :  { %p1884_p0 = scmp.ne.s32.totalorder %s23_s25, %s1883_s26  ;;  %p1889_p2 = scmp.lt.s32.totalorder %s1883_s26, %s1883_s26 }
   0x5   :  { %p1890_p3 = por %p1889_p2, %p1888_p1 }
   0x7   :  { %p1891_p4 = pnand %p1890_p3, %p1884_p0 }
   0x9   :  { %1894 = shalt.err (!%p1891_p4)
}
   0xa   :  { %s1898_s27 = smov 128   ;;  %s1899_s28 = smov 8  }
   0xb   :  { %28 = dma.hbm_to_vmem [thread:$0]  %s2620_s2, 6144, %s23_s25, [#allocation4], %s1898_s27, %s1898_s27, %s1899_s28  }
   0xc   :  { %1895 = dma.done.wait [#allocation4], 6144  }
   0xd   :  { %1896 = vsyncadd [#allocation4], 4294961152  ;;  %v1900_v0 = vmov 0.0   ;;  %vm1901_vm0 = vmmov 0   ;;  %v468_v1 = vld [vmem:[%s2619_s1 + $0xf8] sm:$0xff]  ;;  %v467_v3 = vld [vmem:[%s2619_s1 + $0xf0] sm:$0xff] }
   0xe   :  { %1620 = vmatprep.subr.mxu1 %v1900_v0  ;;  %1652 = vmatprep.mubr.msk.f32.mxu1 %vm1901_vm0, %v1900_v0  ;;  %v452_v2 = vld [vmem:[%s2619_s1 + $0x78] sm:$0xff]  ;;  %v451_v4 = vld [vmem:[%s2619_s1 + $0x70] sm:$0xff]  ;;  %v466_v6 = vld [vmem:[%s2619_s1 + $0xe8] sm:$0xff] }
   0xf   :  { %1416 = vmatprep.subr.mxu0 %v468_v1  ;;  %v484_v5 = vld [vmem:[%s2619_s1 + $0x178] sm:$0xff]  ;;  %v483_v7 = vld [vmem:[%s2619_s1 + $0x170] sm:$0xff]  ;;  %v450_v8 = vld [vmem:[%s2619_s1 + $0x68] sm:$0xff]  ;;  %v40_v1 = vlaneseq }
  0x10   :  { %1417 = vmatpush3.msra.mxu0 %v452_v2  ;;  %1621 = vmatpush3.msra.mxu1 %v484_v5  ;;  %v482_v9 = vld [vmem:[%s2619_s1 + $0x168] sm:$0xff]  ;;  %v465_v10 = vld [vmem:[%s2619_s1 + $0xe0] sm:$0xff]  ;;  %v464_v13 = vld [vmem:[%s2619_s1 + $0xd8] sm:$0xff] }
  0x11   :  { %1418 = vmatprep.subr.mxu0 %v467_v3  ;;  %1622 = vmatprep.subr.mxu1 %v1900_v0  ;;  %v449_v11 = vld [vmem:[%s2619_s1 + $0x60] sm:$0xff]  ;;  %v448_v14 = vld [vmem:[%s2619_s1 + $0x58] sm:$0xff]  ;;  %v463_v16 = vld [vmem:[%s2619_s1 + $0xd0] sm:$0xff]  ;;  %v2166_v2 = vshrl.u32 %v40_v1, 7 }
  0x12   :  { %1419 = vmatpush3.msra.mxu0 %v451_v4  ;;  %1623 = vmatpush3.msra.mxu1 %v483_v7  ;;  %v481_v12 = vld [vmem:[%s2619_s1 + $0x160] sm:$0xff]  ;;  %v480_v15 = vld [vmem:[%s2619_s1 + $0x158] sm:$0xff]  ;;  %v447_v17 = vld [vmem:[%s2619_s1 + $0x50] sm:$0xff]  ;;  %v153_v4 = vand.u32 127, %v40_v1 }
  0x13   :  { %1420 = vmatprep.subr.mxu0 %v466_v6  ;;  %1624 = vmatprep.subr.mxu1 %v1900_v0  ;;  %v479_v18 = vld [vmem:[%s2619_s1 + $0x150] sm:$0xff]  ;;  %v462_v19 = vld [vmem:[%s2619_s1 + $0xc8] sm:$0xff]  ;;  %v461_v22 = vld [vmem:[%s2619_s1 + $0xc0] sm:$0xff]  ;;  %v151_v3 = vadd.s32 120, %v2166_v2  ;;  %v150_v7 = vadd.s32 112, %v2166_v2 }
  0x14   :  { %1421 = vmatpush3.msra.mxu0 %v450_v8  ;;  %1625 = vmatpush3.msra.mxu1 %v482_v9  ;;  %v446_v20 = vld [vmem:[%s2619_s1 + $0x48] sm:$0xff]  ;;  %v445_v23 = vld [vmem:[%s2619_s1 + $0x40] sm:$0xff]  ;;  %v460_v25 = vld [vmem:[%s2619_s1 + $0xb8] sm:$0xff]  ;;  %v2169_v6 = vand.u32 7, %v153_v4  ;;  %v149_v9 = vadd.s32 104, %v2166_v2 }
  0x15   :  { %1422 = vmatprep.subr.mxu0 %v465_v10  ;;  %1626 = vmatprep.subr.mxu1 %v1900_v0  ;;  %v478_v21 = vld [vmem:[%s2619_s1 + $0x148] sm:$0xff]  ;;  %v477_v24 = vld [vmem:[%s2619_s1 + $0x140] sm:$0xff]  ;;  %v444_v26 = vld [vmem:[%s2619_s1 + $0x38] sm:$0xff]  ;;  %v263_v5 = vand.u32 7, %v151_v3  ;;  %v256_v8 = vand.u32 7, %v150_v7 }
  0x16   :  { %1423 = vmatpush3.msra.mxu0 %v449_v11  ;;  %1627 = vmatpush3.msra.mxu1 %v481_v12  ;;  %v476_v27 = vld [vmem:[%s2619_s1 + $0x138] sm:$0xff]  ;;  %v459_v28 = vld [vmem:[%s2619_s1 + $0xb0] sm:$0xff]  ;;  %v458_v31 = vld [vmem:[%s2619_s1 + $0xa8] sm:$0xff]  ;;  %v249_v11 = vand.u32 7, %v149_v9 }
  0x17   :  { %1424 = vmatprep.subr.mxu0 %v464_v13  ;;  %1628 = vmatprep.subr.mxu1 %v1900_v0  ;;  %v443_v29 = vld [vmem:[%s2619_s1 + $0x30] sm:$0xff]  ;;  %v442_v32 = vld [vmem:[%s2619_s1 + $0x28] sm:$0xff]  ;;  %v457_v34 = vld [vmem:[%s2619_s1 + $0xa0] sm:$0xff]  ;;  %vm373_vm1 = vcmp.eq.s32.totalorder %v263_v5, %v2169_v6  ;;  %vm372_vm2 = vcmp.eq.s32.totalorder %v256_v8, %v2169_v6  ;;  %v2330_v8 = vmul.u32.u64.low 3817748708, %v2166_v2  ;;  %v2331_v9 = vmul.u32.u64.high 3817748708, %v2166_v2, %v2330_v8 }
  0x18   :  { %1425 = vmatpush3.msra.mxu0 %v448_v14  ;;  %1629 = vmatpush3.msra.mxu1 %v480_v15  ;;  %v475_v30 = vld [vmem:[%s2619_s1 + $0x130] sm:$0xff]  ;;  %v474_v33 = vld [vmem:[%s2619_s1 + $0x128] sm:$0xff]  ;;  %v441_v35 = vld [vmem:[%s2619_s1 + $0x20] sm:$0xff]  ;;  %v1415_v10 = vsel %vm373_vm1, 1.0, %v1900_v0  ;;  %v1414_v13 = vsel %vm372_vm2, 1.0, %v1900_v0  ;;  %v148_v14 = vadd.s32 96, %v2166_v2  ;;  %vm371_vm3 = vcmp.eq.s32.totalorder %v249_v11, %v2169_v6 }
  0x19   :  { %1426 = vmatprep.subr.mxu0 %v463_v16  ;;  %1630 = vmatprep.subr.mxu1 %v1900_v0  ;;  %v473_v36 = vld [vmem:[%s2619_s1 + $0x120] sm:$0xff]  ;;  %v456_v37 = vld [vmem:[%s2619_s1 + $0x98] sm:$0xff]  ;;  %v455_v40 = vld [vmem:[%s2619_s1 + $0x90] sm:$0xff]  ;;  %v2176_v12 = vmul.f32 0.001953125, %v1415_v10  ;;  %v2180_v15 = vmul.f32 0.001953125, %v1414_v13  ;;  %v1413_v16 = vsel %vm371_vm3, 1.0, %v1900_v0 }
  0x1a   :  { %1427 = vmatpush3.msra.mxu0 %v447_v17  ;;  %1631 = vmatpush3.msra.mxu1 %v479_v18  ;;  %v440_v38 = vld [vmem:[%s2619_s1 + $0x18] sm:$0xff]  ;;  %v439_v41 = vld [vmem:[%s2619_s1 + $0x10] sm:$0xff]  ;;  %v454_v43 = vld [vmem:[%s2619_s1 + $0x88] sm:$0xff]  ;;  %v2187_v17 = vmul.f32 0.001953125, %v1413_v16  ;;  %v242_v18 = vand.u32 7, %v148_v14 }
  0x1b   :  { %1428 = vmatprep.subr.mxu0 %v462_v19  ;;  %1632 = vmatprep.subr.mxu1 %v1900_v0  ;;  %v472_v39 = vld [vmem:[%s2619_s1 + $0x118] sm:$0xff]  ;;  %v471_v42 = vld [vmem:[%s2619_s1 + $0x110] sm:$0xff]  ;;  %v438_v44 = vld [vmem:[%s2619_s1 + $0x8] sm:$0xff]  ;;  %v147_v19 = vadd.s32 88, %v2166_v2 }
  0x1c   :  { %1429 = vmatpush3.msra.mxu0 %v446_v20  ;;  %1633 = vmatpush3.msra.mxu1 %v478_v21  ;;  %v427_v45 = vld [vmem:[%s2618_s0 + $0x1] sm:$0xff]  ;;  %v428_v52 = vld [vmem:[%s2618_s0 + $0x9] sm:$0xff]  ;;  %v429_v55 = vld [vmem:[%s2618_s0 + $0x11] sm:$0xff]  ;;  %v146_v20 = vadd.s32 80, %v2166_v2  ;;  %v145_v21 = vadd.s32 72, %v2166_v2  ;;  %vm370_vm4 = vcmp.eq.s32.totalorder %v242_v18, %v2169_v6 }
  0x1d   :  { %1430 = vmatprep.subr.mxu0 %v461_v22  ;;  %1634 = vmatprep.subr.mxu1 %v1900_v0  ;;  %v453_v46 = vld [vmem:[%s2619_s1 + $0x80] sm:$0xff]  ;;  %v470_v47 = vld [vmem:[%s2619_s1 + $0x108] sm:$0xff]  ;;  %v424_v56 = vld [vmem:[%s2618_s0 + $0x10] sm:$0xff]  ;;  %v235_v22 = vand.u32 7, %v147_v19 }
  0x1e   :  { %1431 = vmatpush3.msra.mxu0 %v445_v23  ;;  %1635 = vmatpush3.msra.mxu1 %v477_v24  ;;  %v437_v48 = vld [vmem:[%s2619_s1] sm:$0xff]  ;;  %v423_v53 = vld [vmem:[%s2618_s0 + $0x8] sm:$0xff]  ;;  %v434_v57 = vld [vmem:[%s2618_s0 + $0x12] sm:$0xff]  ;;  %v1412_v23 = vsel %vm370_vm4, 1.0, %v1900_v0 }
  0x1f   :  { %1432 = vmatprep.subr.mxu0 %v460_v25  ;;  %1636 = vmatprep.subr.mxu1 %v1900_v0  ;;  %v422_v49 = vld [vmem:[%s2618_s0] sm:$0xff]  ;;  %v433_v54 = vld [vmem:[%s2618_s0 + $0xa] sm:$0xff]  ;;  %v425_v59 = vld [vmem:[%s2618_s0 + $0x18] sm:$0xff]  ;;  %v2203_v24 = vmul.f32 0.001953125, %v1412_v23  ;;  %vm369_vm5 = vcmp.eq.s32.totalorder %v235_v22, %v2169_v6  ;;  %v228_v25 = vand.u32 7, %v146_v20  ;;  %v52_v20 = vshrl.u32 %v2331_v9, 4 }
  0x20   :  { %1433 = vmatpush3.msra.mxu0 %v444_v26  ;;  %1637 = vmatpush3.msra.mxu1 %v476_v27  ;;  %v469_v50 = vld [vmem:[%s2619_s1 + $0x100] sm:$0xff]  ;;  %v1411_v26 = vsel %vm369_vm5, 1.0, %v1900_v0  ;;  %v221_v27 = vand.u32 7, %v145_v21 }
  0x21   :  { %1434 = vmatprep.subr.mxu0 %v459_v28  ;;  %1638 = vmatprep.subr.mxu1 %v1900_v0  ;;  %v432_v51 = vld [vmem:[%s2618_s0 + $0x2] sm:$0xff]  ;;  %v430_v58 = vld [vmem:[%s2618_s0 + $0x19] sm:$0xff]  ;;  %v144_v28 = vadd.s32 64, %v2166_v2  ;;  %vm368_vm6 = vcmp.eq.s32.totalorder %v228_v25, %v2169_v6  ;;  %v53_v25 = vmul.u32 18, %v52_v20 }
  0x22   :  { %1435 = vmatpush3.msra.mxu0 %v443_v29  ;;  %1639 = vmatpush3.msra.mxu1 %v475_v30  ;;  %v435_v60 = vld [vmem:[%s2618_s0 + $0x1a] sm:$0xff]  ;;  %v436_v63 = vld [vmem:[%s2618_s0 + $0x22] sm:$0x3]  ;;  %v143_v29 = vadd.s32 56, %v2166_v2  ;;  %v2210_v30 = vmul.f32 0.001953125, %v1411_v26  ;;  %vm367_vm7 = vcmp.eq.s32.totalorder %v221_v27, %v2169_v6 }
  0x23   :  { %1436 = vmatprep.subr.mxu0 %v458_v31  ;;  %1640 = vmatprep.subr.mxu1 %v1900_v0  ;;  %v431_v61 = vld [vmem:[%s2618_s0 + $0x21] sm:$0x3]  ;;  %v1410_v31 = vsel %vm368_vm6, 1.0, %v1900_v0 }
  0x24   :  { %1437 = vmatpush3.msra.mxu0 %v442_v32  ;;  %1641 = vmatpush3.msra.mxu1 %v474_v33  ;;  %v426_v62 = vld [vmem:[%s2618_s0 + $0x20] sm:$0x3]  ;;  %v214_v32 = vand.u32 7, %v144_v28  ;;  %v2219_v33 = vmul.f32 0.001953125, %v1410_v31  ;;  %v54_v31 = vsub.s32 %v2166_v2, %v53_v25 }
  0x25   :  { %1438 = vmatprep.subr.mxu0 %v457_v34  ;;  %1642 = vmatprep.subr.mxu1 %v1900_v0  ;;  %v1409_v34 = vsel %vm367_vm7, 1.0, %v1900_v0 }
  0x26   :  { %1439 = vmatpush3.msra.mxu0 %v441_v35  ;;  %1643 = vmatpush3.msra.mxu1 %v473_v36  ;;  %vm366_vm8 = vcmp.eq.s32.totalorder %v214_v32, %v2169_v6  ;;  %v207_v35 = vand.u32 7, %v143_v29  ;;  %v2227_v36 = vmul.f32 0.001953125, %v1409_v34  ;;  %vm101_vm4 = vcmp.ne.s32.totalorder %v54_v31, 0 }
  0x27   :  { %1440 = vmatprep.subr.mxu0 %v456_v37  ;;  %1644 = vmatprep.subr.mxu1 %v1900_v0  ;;  %v1408_v37 = vsel %vm366_vm8, 1.0, %v1900_v0  ;;  %vm106_vm5 = vcmp.lt.s32.totalorder %v54_v31, 0 }
  0x28   :  { %1441 = vmatpush3.msra.mxu0 %v440_v38  ;;  %1645 = vmatpush3.msra.mxu1 %v472_v39  ;;  %v142_v38 = vadd.s32 48, %v2166_v2  ;;  %v2233_v39 = vmul.f32 0.001953125, %v1408_v37  ;;  %vm365_vm9 = vcmp.eq.s32.totalorder %v207_v35, %v2169_v6 }
  0x29   :  { %1442 = vmatprep.subr.mxu0 %v455_v40  ;;  %1646 = vmatprep.subr.mxu1 %v1900_v0  ;;  %v2237_v40 = vadd.s32 32, %v2166_v2 }
  0x2a   :  { %1443 = vmatpush3.msra.mxu0 %v439_v41  ;;  %1647 = vmatpush3.msra.mxu1 %v471_v42  ;;  %v200_v41 = vand.u32 7, %v142_v38  ;;  %v141_v42 = vadd.s32 40, %v2166_v2 }
  0x2b   :  { %1444 = vmatprep.subr.mxu0 %v454_v43  ;;  %1648 = vmatprep.subr.mxu1 %v1900_v0  ;;  %v2244_v43 = vadd.s32 24, %v2166_v2  ;;  %v2342_v16 = vmul.u32.u64.low 3817748708, %v2237_v40  ;;  %v2343_v18 = vmul.u32.u64.high 3817748708, %v2237_v40, %v2342_v16 }
  0x2c   :  { %1445 = vmatpush3.msra.mxu0 %v438_v44  ;;  %549 = vmatprep.mubr.f32.mxu0 %v427_v45  ;;  %v1407_v44 = vsel %vm365_vm9, 1.0, %v1900_v0  ;;  %vm364_vm10 = vcmp.eq.s32.totalorder %v200_v41, %v2169_v6  ;;  %vm2359_vm9 = vmand %vm106_vm5, %vm101_vm4 }
  0x2d   :  { %1446 = vmatprep.subr.mxu0 %v453_v46  ;;  %1649 = vmatpush3.msra.mxu1 %v470_v47  ;;  %v2250_v45 = vmul.f32 0.001953125, %v1407_v44  ;;  %v193_v46 = vand.u32 7, %v141_v42  ;;  %v186_v47 = vand.u32 7, %v2237_v40  ;;  %v96_v27 = vshrl.u32 %v2343_v18, 4 }
  0x2e   :  { %1447 = vmatpush3.msra.mxu0 %v437_v48  ;;  %1650 = vmatprep.subr.mxu1 %v1900_v0  ;;  %v1406_v48 = vsel %vm364_vm10, 1.0, %v1900_v0  ;;  %v2338_v13 = vmul.u32.u64.low 3817748708, %v2244_v43  ;;  %v2339_v14 = vmul.u32.u64.high 3817748708, %v2244_v43, %v2338_v13 }
  0x2f   :  { %550 = vmatmul.mubr.f32.vlgmr.msra.gmra.mxu0 %v422_v49  ;;  %1651 = vmatpush3.msra.mxu1 %v469_v50  ;;  %v179_v49 = vand.u32 7, %v2244_v43  ;;  %v2260_v50 = vadd.s32 16, %v2166_v2  ;;  %vm363_vm11 = vcmp.eq.s32.totalorder %v193_v46, %v2169_v6  ;;  %vm362_vm12 = vcmp.eq.s32.totalorder %v186_v47, %v2169_v6 }
  0x30   :  { %1653 = vmatmul.mubr.f32.vlgmr.msra.gmra.mxu1 %v432_v51  ;;  %554 = vmatprep.mubr.f32.mxu0 %v428_v52  ;;  %v2263_v51 = vmul.f32 0.001953125, %v1406_v48  ;;  %v2269_v52 = vadd.s32 8, %v2166_v2  ;;  %v85_v23 = vshrl.u32 %v2339_v14, 4  ;;  %v97_v35 = vmul.u32 18, %v96_v27 }
  0x31   :  { %1655 = vmatprep.mubr.msk.f32.mxu1 %vm1901_vm0, %v1900_v0  ;;  %1667 = vmatprep.subr.mxu0 %v1900_v0  ;;  %vm361_vm13 = vcmp.eq.s32.totalorder %v179_v49, %v2169_v6  ;;  %v2334_v10 = vmul.u32.u64.low 3817748708, %v2260_v50  ;;  %v2335_v11 = vmul.u32.u64.high 3817748708, %v2260_v50, %v2334_v10 }
  0x32   :  { %1702 = vmatprep.subr.mxu1 %v1900_v0  ;;  %1668 = vmatpush3.msra.mxu0 %v2176_v12  ;;  %v86_v29 = vmul.u32 18, %v85_v23  ;;  %v98_v48 = vsub.s32 %v2237_v40, %v97_v35 }
  0x33   :  { %555 = vmatmul.mubr.f32.gmra.mxu0 %v423_v53  ;;  %1703 = vmatpush3.msra.mxu1 %v2176_v12  ;;  %v1405_v53 = vsel %vm363_vm11, 1.0, %v1900_v0  ;;  %v74_v21 = vshrl.u32 %v2335_v11, 4 }
  0x34   :  { %1656 = vmatmul.mubr.f32.gmra.mxu1 %v433_v54  ;;  %559 = vmatprep.mubr.f32.mxu0 %v429_v55  ;;  %v1404_v54 = vsel %vm362_vm12, 1.0, %v1900_v0  ;;  %v2277_v55 = vmul.f32 0.001953125, %v1405_v53  ;;  %v87_v38 = vsub.s32 %v2244_v43, %v86_v29  ;;  %v120_v9 = vadd.s32 18, %v98_v48 }
  0x35   :  { %1658 = vmatprep.mubr.msk.f32.mxu1 %vm1901_vm0, %v1900_v0  ;;  %1669 = vmatprep.subr.mxu0 %v1900_v0  ;;  %v75_v26 = vmul.u32 18, %v74_v21 }
  0x36   :  { %1704 = vmatprep.subr.mxu1 %v1900_v0  ;;  %1670 = vmatpush3.msra.mxu0 %v2180_v15  ;;  %vm104_vm10 = vcmp.ne.s32.totalorder %v87_v38, 0  ;;  %vm109_vm11 = vcmp.lt.s32.totalorder %v87_v38, 0 }
  0x37   :  { %560 = vmatmul.mubr.f32.gmra.mxu0 %v424_v56  ;;  %1705 = vmatpush3.msra.mxu1 %v2180_v15  ;;  %v2279_v56 = vmul.f32 0.001953125, %v1404_v54  ;;  %v76_v32 = vsub.s32 %v2260_v50, %v75_v26 }
  0x38   :  { %1659 = vmatmul.mubr.f32.gmra.mxu1 %v434_v57  ;;  %564 = vmatprep.mubr.f32.mxu0 %v430_v58  ;;  %v1403_v57 = vsel %vm361_vm13, 1.0, %v1900_v0  ;;  %v172_v58 = vand.u32 7, %v2260_v50  ;;  %v116_v50 = vadd.s32 18, %v54_v31  ;;  %vm2369_vm13 = vmand %vm109_vm11, %vm104_vm10 }
  0x39   :  { %1661 = vmatprep.mubr.msk.f32.mxu1 %vm1901_vm0, %v1900_v0  ;;  %1671 = vmatprep.subr.mxu0 %v1900_v0  ;;  %vm103_vm6 = vcmp.ne.s32.totalorder %v76_v32, 0  ;;  %vm108_vm7 = vcmp.lt.s32.totalorder %v76_v32, 0 }
  0x3a   :  { %1706 = vmatprep.subr.mxu1 %v1900_v0  ;;  %1672 = vmatpush3.msra.mxu0 %v2187_v17  ;;  %vm360_vm14 = vcmp.eq.s32.totalorder %v172_v58, %v2169_v6  ;;  %vm2363_vm12 = vmand %vm108_vm7, %vm103_vm6  ;;  %vm673_vm7 = vcmask 1041408  }
  0x3b   :  { %565 = vmatmul.mubr.f32.gmra.mxu0 %v425_v59  ;;  %1707 = vmatpush3.msra.mxu1 %v2187_v17  ;;  %v165_v59 = vand.u32 7, %v2269_v52 }
  0x3c   :  { %1662 = vmatmul.mubr.f32.gmra.mxu1 %v435_v60  ;;  %569 = vmatprep.mubr.f32.mxu0 %v431_v61  ;;  %v2288_v60 = vmul.f32 0.001953125, %v1403_v57  ;;  %v1402_v61 = vsel %vm360_vm14, 1.0, %v1900_v0  ;;  %vm105_vm14 = vcmp.ne.s32.totalorder %v98_v48, 0 }
  0x3d   :  { %1664 = vmatprep.mubr.msk.f32.mxu1 %vm1901_vm0, %v1900_v0  ;;  %1673 = vmatprep.subr.mxu0 %v1900_v0  ;;  %vm359_vm15 = vcmp.eq.s32.totalorder %v165_v59, %v2169_v6  ;;  %v119_v59 = vadd.s32 18, %v87_v38 }
  0x3e   :  { %1708 = vmatprep.subr.mxu1 %v1900_v0  ;;  %1674 = vmatpush3.msra.mxu0 %v2203_v24  ;;  %v1401_v1 = vsel %vm359_vm15, 1.0, %v1900_v0  ;;  %vm110_vm15 = vcmp.lt.s32.totalorder %v98_v48, 0 }
  0x3f   :  { %570 = vmatmul.mubr.f32.gmra.mxu0 %v426_v62  ;;  %1709 = vmatpush3.msra.mxu1 %v2203_v24  ;;  %v158_v62 = vand.u32 7, %v2166_v2  ;;  %v2306_v3 = vmul.f32 0.001953125, %v1401_v1  ;;  %v121_v1 = vsel %vm2359_vm9, %v116_v50, %v54_v31  ;;  %v124_v13 = vsel %vm2369_vm13, %v119_v59, %v87_v38 }
  0x40   :  { %1665 = vmatmul.mubr.f32.gmra.mxu1 %v436_v63  ;;  %1699 = vmatprep.mubr.msk.f32.mxu0 %vm1901_vm0, %v1900_v0  ;;  %v2298_v63 = vmul.f32 0.001953125, %v1402_v61  ;;  %vm129_vm5 = vcmp.lt.s32.totalorder %v124_v13, 16  ;;  %vm911_vm9 = vcmask 1042432  }
  0x41   :  { %1734 = vmatprep.mubr.msk.f32.mxu1 %vm1901_vm0, %v1900_v0  ;;  %1675 = vmatprep.subr.mxu0 %v1900_v0  ;;  %vm358_vm1 = vcmp.eq.s32.totalorder %v158_v62, %v2169_v6  ;;  %v2326_v6 = vmul.u32.u64.low 3817748708, %v2269_v52  ;;  %v2327_v7 = vmul.u32.u64.high 3817748708, %v2269_v52, %v2326_v6 }
  0x42   :  { %1710 = vmatprep.subr.mxu1 %v1900_v0  ;;  %1676 = vmatpush3.msra.mxu0 %v2210_v30  ;;  %v1400_v4 = vsel %vm358_vm1, 1.0, %v1900_v0 }
  0x43   :  { %1711 = vmatpush3.msra.mxu1 %v2210_v30  ;;  %1677 = vmatprep.subr.mxu0 %v1900_v0  ;;  %v2313_v5 = vmul.f32 0.001953125, %v1400_v4  ;;  %v63_v19 = vshrl.u32 %v2327_v7, 4 }
  0x44   :  { %1712 = vmatprep.subr.mxu1 %v1900_v0  ;;  %1678 = vmatpush3.msra.mxu0 %v2219_v33 }
  0x45   :  { %1713 = vmatpush3.msra.mxu1 %v2219_v33  ;;  %1679 = vmatprep.subr.mxu0 %v1900_v0  ;;  %v64_v22 = vmul.u32 18, %v63_v19 }
  0x46   :  { %1714 = vmatprep.subr.mxu1 %v1900_v0  ;;  %1680 = vmatpush3.msra.mxu0 %v2227_v36 }
  0x47   :  { %1715 = vmatpush3.msra.mxu1 %v2227_v36  ;;  %1681 = vmatprep.subr.mxu0 %v1900_v0  ;;  %v65_v28 = vsub.s32 %v2269_v52, %v64_v22  ;;  %v118_v52 = vadd.s32 18, %v76_v32 }
  0x48   :  { %1716 = vmatprep.subr.mxu1 %v1900_v0  ;;  %1682 = vmatpush3.msra.mxu0 %v2233_v39 }
  0x49   :  { %1717 = vmatpush3.msra.mxu1 %v2233_v39  ;;  %1683 = vmatprep.subr.mxu0 %v1900_v0  ;;  %vm102_vm2 = vcmp.ne.s32.totalorder %v65_v28, 0  ;;  %vm107_vm3 = vcmp.lt.s32.totalorder %v65_v28, 0  ;;  %v117_v44 = vadd.s32 18, %v65_v28  ;;  %v123_v4 = vsel %vm2363_vm12, %v118_v52, %v76_v32 }
  0x4a   :  { %1718 = vmatprep.subr.mxu1 %v1900_v0  ;;  %1684 = vmatpush3.msra.mxu0 %v2250_v45  ;;  %vm2354_vm8 = vmand %vm107_vm3, %vm102_vm2  ;;  %vm126_vm3 = vcmp.lt.s32.totalorder %v121_v1, 16  ;;  %vm128_vm4 = vcmp.lt.s32.totalorder %v123_v4, 16  ;;  %v2422_v4 = vsub.s32 0, %v2166_v2 }
  0x4b   :  { %1719 = vmatpush3.msra.mxu1 %v2250_v45  ;;  %1685 = vmatprep.subr.mxu0 %v1900_v0  ;;  %v122_v57 = vsel %vm2354_vm8, %v117_v44, %v65_v28  ;;  %vm2379_vm2 = vmand %vm110_vm15, %vm105_vm14  ;;  %v2395_v26 = vsel %vm126_vm3, 1.0, %v1900_v0  ;;  %v2398_v27 = vsel %vm128_vm4, 1.0, %v1900_v0  ;;  %vm895_vm8 = vcmask 1040384  }
  0x4c   :  { %1720 = vmatprep.subr.mxu1 %v1900_v0  ;;  %1686 = vmatpush3.msra.mxu0 %v2263_v51  ;;  %vm127_vm1 = vcmp.lt.s32.totalorder %v122_v57, 16  ;;  %v125_v25 = vsel %vm2379_vm2, %v120_v9, %v98_v48  ;;  %vm1873_vm10 = vmneg %vm895_vm8 }
  0x4d   :  { %1721 = vmatpush3.msra.mxu1 %v2263_v51  ;;  %1687 = vmatprep.subr.mxu0 %v1900_v0  ;;  %v2386_v19 = vsel %vm127_vm1, 1.0, %v1900_v0  ;;  %vm130_vm6 = vcmp.lt.s32.totalorder %v125_v25, 16 }
  0x4e   :  { %1722 = vmatprep.subr.mxu1 %v1900_v0  ;;  %1688 = vmatpush3.msra.mxu0 %v2277_v55  ;;  %v2414_v49 = vsel %vm130_vm6, 1.0, %v1900_v0 }
  0x4f   :  { %1723 = vmatpush3.msra.mxu1 %v2277_v55  ;;  %1689 = vmatprep.subr.mxu0 %v1900_v0 }
  0x50   :  { %1724 = vmatprep.subr.mxu1 %v1900_v0  ;;  %1690 = vmatpush3.msra.mxu0 %v2279_v56 }
  0x51   :  { %1725 = vmatpush3.msra.mxu1 %v2279_v56  ;;  %1691 = vmatprep.subr.mxu0 %v1900_v0 }
  0x52   :  { %1726 = vmatprep.subr.mxu1 %v1900_v0  ;;  %1692 = vmatpush3.msra.mxu0 %v2288_v60 }
  0x53   :  { %1727 = vmatpush3.msra.mxu1 %v2288_v60  ;;  %1693 = vmatprep.subr.mxu0 %v1900_v0 }
  0x54   :  { %1728 = vmatprep.subr.mxu1 %v1900_v0  ;;  %1694 = vmatpush3.msra.mxu0 %v2298_v63 }
  0x55   :  { %1729 = vmatpush3.msra.mxu1 %v2298_v63  ;;  %1695 = vmatprep.subr.mxu0 %v1900_v0 }
  0x56   :  { %1730 = vmatprep.subr.mxu1 %v1900_v0  ;;  %1696 = vmatpush3.msra.mxu0 %v2306_v3 }
  0x57   :  { %1731 = vmatpush3.msra.mxu1 %v2306_v3  ;;  %1697 = vmatprep.subr.mxu0 %v1900_v0 }
  0x58   :  { %1732 = vmatprep.subr.mxu1 %v1900_v0  ;;  %1698 = vmatpush3.msra.mxu0 %v2313_v5 }
  0x59   :  { %1733 = vmatpush3.msra.mxu1 %v2313_v5 }
  0x5a   :  { %1737 = vmatprep.subr.mxu1 %v1900_v0 }
  0xef   :  { %v1448_v34 = vpop.f32.mrf.mxu0 }
  0xf0   :  { %v641_v37 = vpop.f32.mrf.mxu1 }
  0xf1   :  { %v1449_v41 = vpop.f32.mrf.mxu0 }
  0xf2   :  { %v1654_v42 = vpop.f32.mrf.mxu1  ;;  %v1450_v7 = vadd.f32 %v1449_v41, %v1448_v34  ;;  %v2403_v34 = vsel %vm129_vm5, 1.0, %v1900_v0 }
  0xf3   :  { %v1451_v46 = vpop.f32.mrf.mxu0 }
  0xf4   :  { %v646_v43 = vpop.f32.mrf.mxu1  ;;  %v2388_v21 = vadd.f32 %v1450_v7, %v641_v37 }
  0xf5   :  { %v1452_v53 = vpop.f32.mrf.mxu0 }
  0xf6   :  { %v1657_v58 = vpop.f32.mrf.mxu1  ;;  %v1453_v40 = vadd.f32 %v1452_v53, %v1451_v46  ;;  %v665_v38 = vmul.f32 %v2395_v26, %v2388_v21 }
  0xf7   :  { %v1454_v61 = vpop.f32.mrf.mxu0 }
  0xf8   :  { %v651_v6 = vpop.f32.mrf.mxu1  ;;  %v2383_v16 = vadd.f32 %v1453_v40, %v646_v43 }
  0xf9   :  { %v1455_v8 = vpop.f32.mrf.mxu0 }
  0xfa   :  { %v1456_v10 = vadd.f32 %v1455_v8, %v1454_v61  ;;  %v1660_v11 = vpop.f32.mrf.mxu1  ;;  %v666_v31 = vmul.f32 %v2386_v19, %v2383_v16 }
  0xfb   :  { %v1457_v18 = vpop.f32.mrf.mxu0 }
  0xfc   :  { %v656_v20 = vpop.f32.mrf.mxu1  ;;  %v2390_v22 = vadd.f32 %v1456_v10, %v651_v6  ;;  %v670_v47 = vadd.f32 %v666_v31, %v665_v38 }
  0xfd   :  { %v1458_v23 = vpop.f32.mrf.mxu0 }
  0xfe   :  { %v1459_v28 = vadd.f32 %v1458_v23, %v1457_v18  ;;  %v1663_v29 = vpop.f32.mrf.mxu1  ;;  %v667_v41 = vmul.f32 %v2398_v27, %v2390_v22 }
  0xff   :  { %v1460_v32 = vpop.f32.mrf.mxu0 }
 0x100   :  { %v2405_v35 = vadd.f32 %v1459_v28, %v656_v20  ;;  %v661_v37 = vpop.f32.mrf.mxu1  ;;  %v671_v43 = vadd.f32 %v670_v47, %v667_v41 }
 0x101   :  { %v1461_v42 = vpop.f32.mrf.mxu0 }
 0x102   :  { %v1462_v44 = vadd.f32 %v1461_v42, %v1460_v32  ;;  %v1666_v46 = vpop.f32.mrf.mxu1  ;;  %v668_v48 = vmul.f32 %v2403_v34, %v2405_v35 }
 0x104   :  { %v2416_v50 = vadd.f32 %v1462_v44, %v661_v37  ;;  %v672_v53 = vadd.f32 %v671_v43, %v668_v48 }
 0x106   :  { %v669_v52 = vmul.f32 %v2414_v49, %v2416_v50 }
 0x108   :  { %v674_v54 = vsel %vm673_vm7, %v669_v52, 0.0 }
 0x109   :  { %v675_v57 = vadd.f32 %v674_v54, %v672_v53 }
 0x10b   :  { %v676_v58 = vrot.slane %v675_v57, 4 }
 0x10d   :  { %v677_v59 = vadd.f32 %v676_v58, %v675_v57  ;;  %v964_v57 = vld [vmem:[#allocation3 + $0xf8] sm:$0xff] }
 0x10e   :  { %v980_v58 = vld [vmem:[#allocation3 + $0x178] sm:$0xff]  ;;  %1518 = vmatprep.subr.mxu0 %v964_v57  ;;  %v937_v57 = vld [vmem:[#allocation3 + $0x20] sm:$0xff] }
 0x10f   :  { %v678_v40 = vrot.slane %v677_v59, 2 }
 0x111   :  { %v679_v61 = vadd.f32 %v678_v40, %v677_v59  ;;  %v948_v59 = vld [vmem:[#allocation3 + $0x78] sm:$0xff]  ;;  %v963_v40 = vld [vmem:[#allocation3 + $0xf0] sm:$0xff] }
 0x113   :  { %v680_v62 = vrot.slane %v679_v61, 1 }
 0x115   :  { %v681_v1 = vadd.f32 %v680_v62, %v679_v61  ;;  %v979_v61 = vld [vmem:[#allocation3 + $0x170] sm:$0xff] }
 0x116   :  { %v947_v62 = vld [vmem:[#allocation3 + $0x70] sm:$0xff] }
 0x117   :  { %1700 = vmatmul.mubr.f32.vlgmr.msra.gmra.mxu0 %v681_v1  ;;  %v962_v1 = vld [vmem:[#allocation3 + $0xe8] sm:$0xff] }
 0x118   :  { %1519 = vmatpush3.msra.mxu0 %v948_v59  ;;  %v968_v59 = vld [vmem:[#allocation3 + $0x118] sm:$0xff] }
 0x119   :  { %1520 = vmatprep.subr.mxu0 %v963_v40  ;;  %v936_v40 = vld [vmem:[#allocation3 + $0x18] sm:$0xff] }
 0x11a   :  { %1521 = vmatpush3.msra.mxu0 %v947_v62  ;;  %v967_v62 = vld [vmem:[#allocation3 + $0x110] sm:$0xff] }
 0x11b   :  { %1522 = vmatprep.subr.mxu0 %v962_v1  ;;  %v935_v1 = vld [vmem:[#allocation3 + $0x10] sm:$0xff] }
 0x1d7   :  { %v2424_v6 = vpop.f32.mrf.mxu0 }
 0x1d8   :  { %v755_v7 = vrot.slane %v2424_v6, %v2422_v4 }
 0x1d9   :  { %v1701_v8 = vpop.f32.mrf.mxu0 }
 0x1da   :  { %v756_v9 = vsub.f32 %v2388_v21, %v755_v7  ;;  %v757_v10 = vsub.f32 %v2383_v16, %v755_v7  ;;  %v758_v11 = vsub.f32 %v2390_v22, %v755_v7  ;;  %v759_v13 = vsub.f32 %v2405_v35, %v755_v7  ;;  %v946_v8 = vld [vmem:[#allocation3 + $0x68] sm:$0xff] }
 0x1db   :  { %v760_v14 = vsub.f32 %v2416_v50, %v755_v7  ;;  %v978_v7 = vld [vmem:[#allocation3 + $0x168] sm:$0xff]  ;;  %1523 = vmatpush3.msra.mxu0 %v946_v8 }
 0x1dc   :  { %v761_v18 = vmul.f32 %v2395_v26, %v756_v9  ;;  %v762_v2 = vmul.f32 %v2386_v19, %v757_v10  ;;  %v763_v20 = vmul.f32 %v2398_v27, %v758_v11  ;;  %v764_v25 = vmul.f32 %v2403_v34, %v759_v13  ;;  %v961_v9 = vld [vmem:[#allocation3 + $0xe0] sm:$0xff]  ;;  %v960_v13 = vld [vmem:[#allocation3 + $0xd8] sm:$0xff]  ;;  %v966_v8 = vld [vmem:[#allocation3 + $0x108] sm:$0xff] }
 0x1dd   :  { %v765_v23 = vmul.f32 %v2414_v49, %v760_v14  ;;  %v977_v10 = vld [vmem:[#allocation3 + $0x160] sm:$0xff]  ;;  %1524 = vmatprep.subr.mxu0 %v961_v9  ;;  %v976_v14 = vld [vmem:[#allocation3 + $0x158] sm:$0xff]  ;;  %v934_v9 = vld [vmem:[#allocation3 + $0x8] sm:$0xff] }
 0x1de   :  { %v766_v28 = vmul.f32 %v761_v18, %v761_v18  ;;  %v767_v29 = vmul.f32 %v762_v2, %v762_v2  ;;  %v768_v31 = vmul.f32 %v763_v20, %v763_v20  ;;  %v769_v38 = vmul.f32 %v764_v25, %v764_v25  ;;  %v945_v11 = vld [vmem:[#allocation3 + $0x60] sm:$0xff]  ;;  %v944_v18 = vld [vmem:[#allocation3 + $0x58] sm:$0xff]  ;;  %v959_v2 = vld [vmem:[#allocation3 + $0xd0] sm:$0xff] }
 0x1df   :  { %v770_v37 = vmul.f32 %v765_v23, %v765_v23  ;;  %1525 = vmatpush3.msra.mxu0 %v945_v11  ;;  %v975_v20 = vld [vmem:[#allocation3 + $0x150] sm:$0xff]  ;;  %v958_v25 = vld [vmem:[#allocation3 + $0xc8] sm:$0xff]  ;;  %v965_v11 = vld [vmem:[#allocation3 + $0x100] sm:$0xff] }
 0x1e0   :  { %v771_v32 = vadd.f32 %v767_v29, %v766_v28  ;;  %1526 = vmatprep.subr.mxu0 %v960_v13  ;;  %v943_v23 = vld [vmem:[#allocation3 + $0x50] sm:$0xff]  ;;  %v974_v28 = vld [vmem:[#allocation3 + $0x148] sm:$0xff]  ;;  %v933_v13 = vld [vmem:[#allocation3] sm:$0xff] }
 0x1e1   :  { %v774_v44 = vsel %vm673_vm7, %v770_v37, 0.0  ;;  %1527 = vmatpush3.msra.mxu0 %v944_v18  ;;  %v942_v29 = vld [vmem:[#allocation3 + $0x48] sm:$0xff]  ;;  %v941_v37 = vld [vmem:[#allocation3 + $0x40] sm:$0xff] }
 0x1e2   :  { %v772_v41 = vadd.f32 %v771_v32, %v768_v31  ;;  %1528 = vmatprep.subr.mxu0 %v959_v2  ;;  %v957_v31 = vld [vmem:[#allocation3 + $0xc0] sm:$0xff] }
 0x1e3   :  { %1529 = vmatpush3.msra.mxu0 %v943_v23  ;;  %v973_v32 = vld [vmem:[#allocation3 + $0x140] sm:$0xff] }
 0x1e4   :  { %v773_v42 = vadd.f32 %v772_v41, %v769_v38  ;;  %1530 = vmatprep.subr.mxu0 %v958_v25  ;;  %v956_v38 = vld [vmem:[#allocation3 + $0xb8] sm:$0xff] }
 0x1e5   :  { %1531 = vmatpush3.msra.mxu0 %v942_v29  ;;  %v972_v41 = vld [vmem:[#allocation3 + $0x138] sm:$0xff] }
 0x1e6   :  { %v775_v46 = vadd.f32 %v774_v44, %v773_v42  ;;  %1532 = vmatprep.subr.mxu0 %v957_v31  ;;  %v940_v42 = vld [vmem:[#allocation3 + $0x38] sm:$0xff]  ;;  %v955_v44 = vld [vmem:[#allocation3 + $0xb0] sm:$0xff] }
 0x1e7   :  { %1533 = vmatpush3.msra.mxu0 %v941_v37 }
 0x1e8   :  { %v776_v47 = vrot.slane %v775_v46, 4  ;;  %1534 = vmatprep.subr.mxu0 %v956_v38 }
 0x1e9   :  { %1535 = vmatpush3.msra.mxu0 %v940_v42 }
 0x1ea   :  { %v777_v48 = vadd.f32 %v776_v47, %v775_v46  ;;  %v971_v46 = vld [vmem:[#allocation3 + $0x130] sm:$0xff]  ;;  %1536 = vmatprep.subr.mxu0 %v955_v44 }
 0x1eb   :  { %v939_v47 = vld [vmem:[#allocation3 + $0x30] sm:$0xff] }
 0x1ec   :  { %v778_v43 = vrot.slane %v777_v48, 2  ;;  %1537 = vmatpush3.msra.mxu0 %v939_v47 }
 0x1ee   :  { %v779_v52 = vadd.f32 %v778_v43, %v777_v48  ;;  %v954_v48 = vld [vmem:[#allocation3 + $0xa8] sm:$0xff] }
 0x1ef   :  { %v970_v43 = vld [vmem:[#allocation3 + $0x128] sm:$0xff]  ;;  %1538 = vmatprep.subr.mxu0 %v954_v48 }
 0x1f0   :  { %v780_v53 = vrot.slane %v779_v52, 1 }
 0x1f2   :  { %v781_v54 = vadd.f32 %v780_v53, %v779_v52  ;;  %v938_v52 = vld [vmem:[#allocation3 + $0x28] sm:$0xff]  ;;  %v953_v53 = vld [vmem:[#allocation3 + $0xa0] sm:$0xff] }
 0x1f3   :  { %1539 = vmatpush3.msra.mxu0 %v938_v52 }
 0x1f4   :  { %1735 = vmatmul.mubr.f32.vlgmr.msra.gmra.mxu1 %v781_v54  ;;  %v969_v54 = vld [vmem:[#allocation3 + $0x120] sm:$0xff]  ;;  %1540 = vmatprep.subr.mxu0 %v953_v53 }
 0x1f5   :  { %1769 = vmatprep.mubr.msk.f32.mxu1 %vm1901_vm0, %v1900_v0  ;;  %1738 = vmatpush3.msra.mxu1 %v980_v58  ;;  %v952_v58 = vld [vmem:[#allocation3 + $0x98] sm:$0xff] }
 0x1f6   :  { %1739 = vmatprep.subr.mxu1 %v1900_v0  ;;  %1541 = vmatpush3.msra.mxu0 %v937_v57 }
 0x1f7   :  { %1740 = vmatpush3.msra.mxu1 %v979_v61  ;;  %v951_v61 = vld [vmem:[#allocation3 + $0x90] sm:$0xff]  ;;  %1542 = vmatprep.subr.mxu0 %v952_v58 }
 0x1f8   :  { %1741 = vmatprep.subr.mxu1 %v1900_v0  ;;  %1543 = vmatpush3.msra.mxu0 %v936_v40 }
 0x1f9   :  { %1742 = vmatpush3.msra.mxu1 %v978_v7  ;;  %v950_v7 = vld [vmem:[#allocation3 + $0x88] sm:$0xff]  ;;  %1544 = vmatprep.subr.mxu0 %v951_v61 }
 0x1fa   :  { %1743 = vmatprep.subr.mxu1 %v1900_v0  ;;  %1545 = vmatpush3.msra.mxu0 %v935_v1 }
 0x1fb   :  { %1744 = vmatpush3.msra.mxu1 %v977_v10  ;;  %v949_v10 = vld [vmem:[#allocation3 + $0x80] sm:$0xff]  ;;  %1546 = vmatprep.subr.mxu0 %v950_v7 }
 0x1fc   :  { %1745 = vmatprep.subr.mxu1 %v1900_v0  ;;  %1547 = vmatpush3.msra.mxu0 %v934_v9 }
 0x1fd   :  { %1746 = vmatpush3.msra.mxu1 %v976_v14  ;;  %1548 = vmatprep.subr.mxu0 %v949_v10 }
 0x1fe   :  { %1747 = vmatprep.subr.mxu1 %v1900_v0  ;;  %1549 = vmatpush3.msra.mxu0 %v933_v13 }
 0x1ff   :  { %1748 = vmatpush3.msra.mxu1 %v975_v20  ;;  %1784 = vmatprep.subr.mxu0 %v1900_v0  ;;  %v782_v20 = vld [vmem:[%s2621_s3] sm:$0x1] }
 0x200   :  { %1749 = vmatprep.subr.mxu1 %v1900_v0 }
 0x201   :  { %1750 = vmatpush3.msra.mxu1 %v974_v28  ;;  %v855_v28 = vld [vmem:[%s2622_s4] sm:$0x1] }
 0x202   :  { %1751 = vmatprep.subr.mxu1 %v1900_v0 }
 0x203   :  { %1752 = vmatpush3.msra.mxu1 %v973_v32 }
 0x204   :  { %1753 = vmatprep.subr.mxu1 %v1900_v0 }
 0x205   :  { %1754 = vmatpush3.msra.mxu1 %v972_v41 }
 0x206   :  { %1755 = vmatprep.subr.mxu1 %v1900_v0 }
 0x207   :  { %1756 = vmatpush3.msra.mxu1 %v971_v46 }
 0x208   :  { %1757 = vmatprep.subr.mxu1 %v1900_v0 }
 0x209   :  { %1758 = vmatpush3.msra.mxu1 %v970_v43 }
 0x20a   :  { %1759 = vmatprep.subr.mxu1 %v1900_v0 }
 0x20b   :  { %1760 = vmatpush3.msra.mxu1 %v969_v54 }
 0x20c   :  { %1761 = vmatprep.subr.mxu1 %v1900_v0 }
 0x20d   :  { %1762 = vmatpush3.msra.mxu1 %v968_v59 }
 0x20e   :  { %1763 = vmatprep.subr.mxu1 %v1900_v0 }
 0x20f   :  { %1764 = vmatpush3.msra.mxu1 %v967_v62 }
 0x210   :  { %1765 = vmatprep.subr.mxu1 %v1900_v0 }
 0x211   :  { %1766 = vmatpush3.msra.mxu1 %v966_v8 }
 0x212   :  { %1767 = vmatprep.subr.mxu1 %v1900_v0 }
 0x213   :  { %1768 = vmatpush3.msra.mxu1 %v965_v11 }
 0x214   :  { %1819 = vmatprep.subr.mxu1 %v1900_v0 }
 0x2b4   :  { %v849_v14 = vpop.f32.mrf.mxu1 }
 0x2b5   :  { %v850_v18 = vadd.f32 1e-05, %v849_v14 }
 0x2b6   :  { %v1736_v2 = vpop.f32.mrf.mxu1 }
 0x2b7   :  { %1869 = vrsqrt.f32 %v850_v18 }
 0x2c4   :  { %v1870_v23 = vpop.eup %1869 }
 0x2c5   :  { %v854_v25 = vmul.f32 %v1870_v23, %v782_v20 }
 0x2c7   :  { %v856_v29 = vmul.f32 %v854_v25, %v2424_v6  ;;  %v862_v31 = vrot.slane %v854_v25, %v2422_v4 }
 0x2c9   :  { %v857_v32 = vsub.f32 %v855_v28, %v856_v29  ;;  %v864_v37 = vmul.f32 %v862_v31, %v2388_v21  ;;  %v865_v38 = vmul.f32 %v862_v31, %v2383_v16  ;;  %v866_v41 = vmul.f32 %v862_v31, %v2390_v22 }
 0x2ca   :  { %v867_v42 = vmul.f32 %v862_v31, %v2405_v35  ;;  %v868_v46 = vmul.f32 %v862_v31, %v2416_v50 }
 0x2cb   :  { %v873_v44 = vrot.slane %v857_v32, %v2422_v4 }
 0x2cd   :  { %v875_v47 = vadd.f32 %v873_v44, %v864_v37  ;;  %v876_v48 = vadd.f32 %v873_v44, %v865_v38  ;;  %v877_v43 = vadd.f32 %v873_v44, %v866_v41  ;;  %v878_v52 = vadd.f32 %v873_v44, %v867_v42 }
 0x2ce   :  { %v879_v6 = vadd.f32 %v873_v44, %v868_v46 }
 0x2cf   :  { %v880_v53 = vmax.f32 %v875_v47, 0.0  ;;  %v881_v54 = vmax.f32 %v876_v48, 0.0  ;;  %v882_v57 = vmax.f32 %v877_v43, 0.0  ;;  %v883_v58 = vmax.f32 %v878_v52, 0.0 }
 0x2d0   :  { %v884_v21 = vmax.f32 %v879_v6, 0.0 }
 0x2d1   :  { %v885_v16 = vmul.f32 %v2395_v26, %v880_v53  ;;  %v886_v22 = vmul.f32 %v2386_v19, %v881_v54  ;;  %v887_v35 = vmul.f32 %v2398_v27, %v882_v57  ;;  %v888_v59 = vmul.f32 %v2403_v34, %v883_v58 }
 0x2d2   :  { %v889_v50 = vmul.f32 %v2414_v49, %v884_v21 }
 0x2d3   :  { %v896_v40 = vrot.slane %v885_v16, 7  ;;  %v897_v61 = vrot.slane %v886_v22, 7  ;;  %v899_v62 = vrot.slane %v887_v35, 7  ;;  %v901_v1 = vrot.slane %v888_v59, 7 }
 0x2d4   :  { %v903_v7 = vrot.slane %v889_v50, 7 }
 0x2d5   :  { %v898_v8 = vsel %vm895_vm8, %v896_v40, %v897_v61  ;;  %v910_v9 = vsel %vm895_vm8, 0.0, %v896_v40  ;;  %v900_v10 = vsel %vm895_vm8, %v897_v61, %v899_v62  ;;  %v902_v11 = vsel %vm895_vm8, %v899_v62, %v901_v1 }
 0x2d6   :  { %913 = vst [vmem:[#allocation2] sm:$0xff] %v910_v9  ;;  %914 = vst [vmem:[#allocation2 + $0x8] sm:$0xff] %v898_v8  ;;  %v904_v13 = vsel %vm895_vm8, %v901_v1, %v903_v7 }
 0x2d7   :  { %915 = vst [vmem:[#allocation2 + $0x10] sm:$0xff] %v900_v10  ;;  %916 = vst [vmem:[#allocation2 + $0x18] sm:$0xff] %v902_v11  ;;  %v912_v14 = vsel %vm911_vm9, %v904_v13, 0.0 }
 0x2d8   :  { %917 = vst [vmem:[#allocation2 + $0x20] sm:$0xf] %v912_v14 }
 0x2dd   :  { %v923_v18 = vld [vmem:[#allocation2 + $0x1] sm:$0xff] }
 0x2de   :  { %v928_v2 = vld [vmem:[#allocation2 + $0x2] sm:$0xff]  ;;  %1045 = vmatprep.mubr.f32.mxu0 %v923_v18  ;;  %v929_v23 = vld [vmem:[#allocation2 + $0xa] sm:$0xff]  ;;  %v930_v28 = vld [vmem:[#allocation2 + $0x12] sm:$0xff] }
 0x2df   :  { %1770 = vmatmul.mubr.f32.vlgmr.msra.gmra.mxu1 %v928_v2  ;;  %1874 = vmatmul.mubr.msk.f32.vlgmr.msra.gmra.mxu0 %vm1873_vm10, %v896_v40  ;;  %v924_v20 = vld [vmem:[#allocation2 + $0x9] sm:$0xff]  ;;  %v925_v25 = vld [vmem:[#allocation2 + $0x11] sm:$0xff]  ;;  %v931_v29 = vld [vmem:[#allocation2 + $0x1a] sm:$0xff] }
 0x2e0   :  { %1772 = vmatprep.mubr.msk.f32.mxu1 %vm1901_vm0, %v1900_v0  ;;  %1050 = vmatprep.mubr.f32.mxu0 %v924_v20  ;;  %v927_v31 = vld [vmem:[#allocation2 + $0x21] sm:$0x3] }
 0x2e1   :  { %1785 = vmatpush3.msra.mxu0 %v2176_v12  ;;  %1820 = vmatpush3.msra.mxu1 %v2176_v12  ;;  %v926_v12 = vld [vmem:[#allocation2 + $0x19] sm:$0xff]  ;;  %v932_v32 = vld [vmem:[#allocation2 + $0x22] sm:$0x3] }
 0x2e2   :  { %1786 = vmatprep.subr.mxu0 %v1900_v0  ;;  %1821 = vmatprep.subr.mxu1 %v1900_v0  ;;  %v922_v37 = vld [vmem:[#allocation2 + $0x20] sm:$0x3] }
 0x2e3   :  { %1773 = vmatmul.mubr.f32.gmra.mxu1 %v929_v23  ;;  %1787 = vmatpush3.msra.mxu0 %v2180_v15 }
 0x2e4   :  { %1051 = vmatmul.mubr.f32.gmra.mxu0 %v898_v8  ;;  %1775 = vmatprep.mubr.msk.f32.mxu1 %vm1901_vm0, %v1900_v0 }
 0x2e5   :  { %1055 = vmatprep.mubr.f32.mxu0 %v925_v25  ;;  %1788 = vmatprep.subr.mxu0 %v1900_v0 }
 0x2e6   :  { %1789 = vmatpush3.msra.mxu0 %v2187_v17  ;;  %1822 = vmatpush3.msra.mxu1 %v2180_v15 }
 0x2e7   :  { %1776 = vmatmul.mubr.f32.gmra.mxu1 %v930_v28  ;;  %1790 = vmatprep.subr.mxu0 %v1900_v0 }
 0x2e8   :  { %1056 = vmatmul.mubr.f32.gmra.mxu0 %v900_v10  ;;  %1778 = vmatprep.mubr.msk.f32.mxu1 %vm1901_vm0, %v1900_v0 }
 0x2e9   :  { %1060 = vmatprep.mubr.f32.mxu0 %v926_v12  ;;  %1791 = vmatpush3.msra.mxu0 %v2203_v24 }
 0x2ea   :  { %1792 = vmatprep.subr.mxu0 %v1900_v0  ;;  %1823 = vmatprep.subr.mxu1 %v1900_v0 }
 0x2eb   :  { %1779 = vmatmul.mubr.f32.gmra.mxu1 %v931_v29  ;;  %1793 = vmatpush3.msra.mxu0 %v2210_v30 }
 0x2ec   :  { %1061 = vmatmul.mubr.f32.gmra.mxu0 %v902_v11  ;;  %1781 = vmatprep.mubr.msk.f32.mxu1 %vm1901_vm0, %v1900_v0 }
 0x2ed   :  { %1065 = vmatprep.mubr.f32.mxu0 %v927_v31  ;;  %1794 = vmatprep.subr.mxu0 %v1900_v0 }
 0x2ee   :  { %1795 = vmatpush3.msra.mxu0 %v2219_v33  ;;  %1824 = vmatpush3.msra.mxu1 %v2187_v17 }
 0x2ef   :  { %1782 = vmatmul.mubr.f32.gmra.mxu1 %v932_v32  ;;  %1796 = vmatprep.subr.mxu0 %v1900_v0 }
 0x2f0   :  { %1066 = vmatmul.mubr.f32.gmra.mxu0 %v922_v37  ;;  %1825 = vmatprep.subr.mxu1 %v1900_v0 }
 0x2f1   :  { %1797 = vmatpush3.msra.mxu0 %v2227_v36  ;;  %1816 = vmatprep.mubr.msk.f32.mxu0 %vm1901_vm0, %v1900_v0 }
 0x2f2   :  { %1798 = vmatprep.subr.mxu0 %v1900_v0  ;;  %1826 = vmatpush3.msra.mxu1 %v2203_v24 }
 0x2f3   :  { %1799 = vmatpush3.msra.mxu0 %v2233_v39  ;;  %1827 = vmatprep.subr.mxu1 %v1900_v0 }
 0x2f4   :  { %1800 = vmatprep.subr.mxu0 %v1900_v0  ;;  %1828 = vmatpush3.msra.mxu1 %v2210_v30 }
 0x2f5   :  { %1801 = vmatpush3.msra.mxu0 %v2250_v45  ;;  %1829 = vmatprep.subr.mxu1 %v1900_v0 }
 0x2f6   :  { %1802 = vmatprep.subr.mxu0 %v1900_v0  ;;  %1830 = vmatpush3.msra.mxu1 %v2219_v33 }
 0x2f7   :  { %1803 = vmatpush3.msra.mxu0 %v2263_v51  ;;  %1831 = vmatprep.subr.mxu1 %v1900_v0 }
 0x2f8   :  { %1804 = vmatprep.subr.mxu0 %v1900_v0  ;;  %1832 = vmatpush3.msra.mxu1 %v2227_v36 }
 0x2f9   :  { %1805 = vmatpush3.msra.mxu0 %v2277_v55  ;;  %1833 = vmatprep.subr.mxu1 %v1900_v0 }
 0x2fa   :  { %1806 = vmatprep.subr.mxu0 %v1900_v0  ;;  %1834 = vmatpush3.msra.mxu1 %v2233_v39 }
 0x2fb   :  { %1807 = vmatpush3.msra.mxu0 %v2279_v56  ;;  %1835 = vmatprep.subr.mxu1 %v1900_v0 }
 0x2fc   :  { %1808 = vmatprep.subr.mxu0 %v1900_v0  ;;  %1836 = vmatpush3.msra.mxu1 %v2250_v45 }
 0x2fd   :  { %1809 = vmatpush3.msra.mxu0 %v2288_v60  ;;  %1837 = vmatprep.subr.mxu1 %v1900_v0 }
 0x2fe   :  { %1810 = vmatprep.subr.mxu0 %v1900_v0  ;;  %1838 = vmatpush3.msra.mxu1 %v2263_v51 }
 0x2ff   :  { %1811 = vmatpush3.msra.mxu0 %v2298_v63  ;;  %1839 = vmatprep.subr.mxu1 %v1900_v0 }
 0x300   :  { %1812 = vmatprep.subr.mxu0 %v1900_v0  ;;  %1840 = vmatpush3.msra.mxu1 %v2277_v55 }
 0x301   :  { %1813 = vmatpush3.msra.mxu0 %v2306_v3  ;;  %1841 = vmatprep.subr.mxu1 %v1900_v0 }
 0x302   :  { %1814 = vmatprep.subr.mxu0 %v1900_v0  ;;  %1842 = vmatpush3.msra.mxu1 %v2279_v56 }
 0x303   :  { %1815 = vmatpush3.msra.mxu0 %v2313_v5  ;;  %1843 = vmatprep.subr.mxu1 %v1900_v0 }
 0x304   :  { %1851 = vmatprep.mubr.msk.f32.mxu1 %vm1901_vm0, %v1900_v0  ;;  %1844 = vmatpush3.msra.mxu1 %v2288_v60 }
 0x305   :  { %1845 = vmatprep.subr.mxu1 %v1900_v0 }
 0x306   :  { %1846 = vmatpush3.msra.mxu1 %v2298_v63 }
 0x307   :  { %1847 = vmatprep.subr.mxu1 %v1900_v0 }
 0x308   :  { %1848 = vmatpush3.msra.mxu1 %v2306_v3 }
 0x309   :  { %1849 = vmatprep.subr.mxu1 %v1900_v0 }
 0x30a   :  { %1850 = vmatpush3.msra.mxu1 %v2313_v5 }
 0x39f   :  { %v1137_v15 = vpop.f32.mrf.mxu1  ;;  %v1550_v17 = vpop.f32.mrf.mxu0 }
 0x3a1   :  { %v1771_v24 = vpop.f32.mrf.mxu1  ;;  %v1551_v30 = vpop.f32.mrf.mxu0 }
 0x3a2   :  { %v1552_v63 = vadd.f32 %v1551_v30, %v1550_v17 }
 0x3a3   :  { %v1142_v33 = vpop.f32.mrf.mxu1 }
 0x3a4   :  { %v1553_v36 = vpop.f32.mrf.mxu0  ;;  %v2559_v44 = vadd.f32 %v1552_v63, %v1137_v15 }
 0x3a5   :  { %v1774_v39 = vpop.f32.mrf.mxu1 }
 0x3a6   :  { %v1554_v45 = vpop.f32.mrf.mxu0  ;;  %v1161_v57 = vmul.f32 %v2395_v26, %v2559_v44 }
 0x3a7   :  { %v1147_v51 = vpop.f32.mrf.mxu1  ;;  %v1555_v55 = vadd.f32 %v1554_v45, %v1553_v36 }
 0x3a8   :  { %v1556_v56 = vpop.f32.mrf.mxu0 }
 0x3a9   :  { %v1777_v60 = vpop.f32.mrf.mxu1  ;;  %v2557_v42 = vadd.f32 %v1555_v55, %v1142_v33 }
 0x3aa   :  { %v1557_v38 = vpop.f32.mrf.mxu0 }
 0x3ab   :  { %v1558_v41 = vadd.f32 %v1557_v38, %v1556_v56  ;;  %v1152_v3 = vpop.f32.mrf.mxu1  ;;  %v1162_v52 = vmul.f32 %v2386_v19, %v2557_v42 }
 0x3ac   :  { %v1559_v0 = vpop.f32.mrf.mxu0 }
 0x3ad   :  { %v1780_v5 = vpop.f32.mrf.mxu1  ;;  %v2561_v46 = vadd.f32 %v1558_v41, %v1147_v51  ;;  %v1166_v22 = vadd.f32 %v1162_v52, %v1161_v57 }
 0x3ae   :  { %v1560_v47 = vpop.f32.mrf.mxu0 }
 0x3af   :  { %v1561_v48 = vadd.f32 %v1560_v47, %v1559_v0  ;;  %v1157_v43 = vpop.f32.mrf.mxu1  ;;  %v1163_v58 = vmul.f32 %v2398_v27, %v2561_v46 }
 0x3b0   :  { %v1562_v6 = vpop.f32.mrf.mxu0 }
 0x3b1   :  { %v2565_v53 = vadd.f32 %v1561_v48, %v1152_v3  ;;  %v1783_v54 = vpop.f32.mrf.mxu1  ;;  %v1167_v50 = vadd.f32 %v1166_v22, %v1163_v58 }
 0x3b2   :  { %v1563_v21 = vpop.f32.mrf.mxu0  ;;  %v1350_v54 = vld [vmem:[%s2624_s6] sm:$0x1] }
 0x3b3   :  { %v1564_v16 = vadd.f32 %v1563_v21, %v1562_v6  ;;  %v1164_v35 = vmul.f32 %v2403_v34, %v2565_v53 }
 0x3b5   :  { %v1158_v59 = vadd.f32 %v1564_v16, %v1157_v43  ;;  %v1168_v61 = vadd.f32 %v1167_v50, %v1164_v35  ;;  %v1277_v43 = vld [vmem:[%s2623_s5] sm:$0x1] }
 0x3b7   :  { %v1165_v40 = vmul.f32 %v2414_v49, %v1158_v59 }
 0x3b9   :  { %v1169_v62 = vsel %vm673_vm7, %v1165_v40, 0.0 }
 0x3ba   :  { %v1170_v1 = vadd.f32 %v1169_v62, %v1168_v61 }
 0x3bc   :  { %v1171_v7 = vrot.slane %v1170_v1, 4 }
 0x3be   :  { %v1172_v8 = vadd.f32 %v1171_v7, %v1170_v1 }
 0x3c0   :  { %v1173_v9 = vrot.slane %v1172_v8, 2 }
 0x3c2   :  { %v1174_v10 = vadd.f32 %v1173_v9, %v1172_v8 }
 0x3c4   :  { %v1175_v11 = vrot.slane %v1174_v10, 1 }
 0x3c6   :  { %v1176_v13 = vadd.f32 %v1175_v11, %v1174_v10 }
 0x3c8   :  { %1817 = vmatmul.mubr.f32.vlgmr.msra.gmra.mxu0 %v1176_v13 }
 0x488   :  { %v1243_v14 = vpop.f32.mrf.mxu0 }
 0x489   :  { %v1250_v18 = vrot.slane %v1243_v14, %v2422_v4 }
 0x48a   :  { %v1818_v2 = vpop.f32.mrf.mxu0 }
 0x48b   :  { %v1251_v20 = vsub.f32 %v2559_v44, %v1250_v18  ;;  %v1252_v23 = vsub.f32 %v2557_v42, %v1250_v18  ;;  %v1253_v25 = vsub.f32 %v2561_v46, %v1250_v18  ;;  %v1254_v28 = vsub.f32 %v2565_v53, %v1250_v18 }
 0x48c   :  { %v1255_v12 = vsub.f32 %v1158_v59, %v1250_v18 }
 0x48d   :  { %v1256_v29 = vmul.f32 %v2395_v26, %v1251_v20  ;;  %v1257_v31 = vmul.f32 %v2386_v19, %v1252_v23  ;;  %v1258_v32 = vmul.f32 %v2398_v27, %v1253_v25  ;;  %v1259_v15 = vmul.f32 %v2403_v34, %v1254_v28 }
 0x48e   :  { %v1260_v37 = vmul.f32 %v2414_v49, %v1255_v12 }
 0x48f   :  { %v1261_v17 = vmul.f32 %v1256_v29, %v1256_v29  ;;  %v1262_v24 = vmul.f32 %v1257_v31, %v1257_v31  ;;  %v1263_v30 = vmul.f32 %v1258_v32, %v1258_v32  ;;  %v1264_v39 = vmul.f32 %v1259_v15, %v1259_v15 }
 0x490   :  { %v1265_v36 = vmul.f32 %v1260_v37, %v1260_v37 }
 0x491   :  { %v1266_v33 = vadd.f32 %v1262_v24, %v1261_v17 }
 0x492   :  { %v1269_v55 = vsel %vm673_vm7, %v1265_v36, 0.0 }
 0x493   :  { %v1267_v45 = vadd.f32 %v1266_v33, %v1263_v30 }
 0x495   :  { %v1268_v51 = vadd.f32 %v1267_v45, %v1264_v39 }
 0x497   :  { %v1270_v56 = vadd.f32 %v1269_v55, %v1268_v51 }
 0x499   :  { %v1271_v60 = vrot.slane %v1270_v56, 4 }
 0x49b   :  { %v1272_v63 = vadd.f32 %v1271_v60, %v1270_v56 }
 0x49d   :  { %v1273_v38 = vrot.slane %v1272_v63, 2 }
 0x49f   :  { %v1274_v41 = vadd.f32 %v1273_v38, %v1272_v63 }
 0x4a1   :  { %v1275_v3 = vrot.slane %v1274_v41, 1 }
 0x4a3   :  { %v1276_v0 = vadd.f32 %v1275_v3, %v1274_v41 }
 0x4a5   :  { %1852 = vmatmul.mubr.f32.vlgmr.msra.gmra.mxu1 %v1276_v0 }
 0x565   :  { %v1344_v5 = vpop.f32.mrf.mxu1 }
 0x566   :  { %v1345_v47 = vadd.f32 1e-05, %v1344_v5 }
 0x567   :  { %v1853_v48 = vpop.f32.mrf.mxu1 }
 0x568   :  { %1871 = vrsqrt.f32 %v1345_v47 }
 0x575   :  { %v1872_v52 = vpop.eup %1871 }
 0x576   :  { %v1349_v6 = vmul.f32 %v1872_v52, %v1277_v43 }
 0x578   :  { %v1351_v57 = vmul.f32 %v1349_v6, %v1243_v14  ;;  %v1357_v58 = vrot.slane %v1349_v6, %v2422_v4 }
 0x57a   :  { %v1352_v21 = vsub.f32 %v1350_v54, %v1351_v57  ;;  %v1359_v16 = vmul.f32 %v1357_v58, %v2559_v44  ;;  %v1360_v22 = vmul.f32 %v1357_v58, %v2557_v42  ;;  %v1361_v35 = vmul.f32 %v1357_v58, %v2561_v46 }
 0x57b   :  { %v1362_v50 = vmul.f32 %v1357_v58, %v2565_v53  ;;  %v1363_v61 = vmul.f32 %v1357_v58, %v1158_v59 }
 0x57c   :  { %v1368_v40 = vrot.slane %v1352_v21, %v2422_v4 }
 0x57e   :  { %v1370_v62 = vadd.f32 %v1368_v40, %v1359_v16  ;;  %v1371_v1 = vadd.f32 %v1368_v40, %v1360_v22  ;;  %v1372_v7 = vadd.f32 %v1368_v40, %v1361_v35  ;;  %v1373_v8 = vadd.f32 %v1368_v40, %v1362_v50 }
 0x57f   :  { %v1374_v9 = vadd.f32 %v1368_v40, %v1363_v61 }
 0x580   :  { %v1375_v10 = vmax.f32 %v1370_v62, 0.0  ;;  %v1376_v11 = vmax.f32 %v1371_v1, 0.0  ;;  %v1377_v13 = vmax.f32 %v1372_v7, 0.0  ;;  %v1378_v14 = vmax.f32 %v1373_v8, 0.0 }
 0x581   :  { %v1379_v18 = vmax.f32 %v1374_v9, 0.0 }
 0x582   :  { %v1380_v44 = vmul.f32 %v2395_v26, %v1375_v10  ;;  %v1381_v42 = vmul.f32 %v2386_v19, %v1376_v11  ;;  %v1382_v46 = vmul.f32 %v2398_v27, %v1377_v13  ;;  %v1383_v53 = vmul.f32 %v2403_v34, %v1378_v14 }
 0x583   :  { %v1384_v4 = vmul.f32 %v2414_v49, %v1379_v18 }
 0x584   :  { %1385 = vst [vmem:[%s2625_s7] sm:$0xff] %v1380_v44  ;;  %1386 = vst [vmem:[%s2625_s7 + $0x8] sm:$0xff] %v1381_v42 }
 0x585   :  { %1387 = vst [vmem:[%s2625_s7 + $0xe] sm:$0xfc] %v1382_v46  ;;  %1388 = vst [vmem:[%s2625_s7 + $0x16] sm:$0xff] %v1383_v53 }
 0x586   :  { %1389 = vst [vmem:[%s2625_s7 + $0x1e] sm:$0x3] %v1384_v4 }
 0x587   :  { %1394 = vsyncpa [#allocation4], 1 }

</bundles_post_ra>
